<compile_context>
chip_gen: v7x
topology: tpu7x:2x2x1
jax: 0.10.0
libtpu: 0.0.40
codegen_flags: <defaults>
</compile_context>

<pallas_src>
import functools

import jax
import jax.numpy as jnp
from jax import lax
from jax.experimental import pallas as pl
from jax.experimental.pallas import tpu as pltpu

ANCHOR = [[0.1, 0.1], [0.3, 0.3], [0.5, 0.5], [0.8, 0.8]]
FEAT_DEPTH = 32  # `feat_depth` is an undefined global in the torch snippet; pick 32.


def anchor_bbox_jax(anchor, ng):
    """Exact JAX reproduction of anchor_bbox() from models.py -> (na, ng, ng, 4)."""
    na = len(anchor)
    grids = jnp.linspace(0.5 / ng, (ng - 0.5) / ng, ng)
    gy, gx = jnp.meshgrid(grids, grids)  # default 'xy', same as np.meshgrid
    x = jnp.broadcast_to(gx[None], (na, ng, ng)).astype(jnp.float32)
    y = jnp.broadcast_to(gy[None], (na, ng, ng)).astype(jnp.float32)
    a = jnp.broadcast_to(
        jnp.asarray(anchor, jnp.float32).reshape(na, 1, 1, 2), (na, ng, ng, 2)
    )
    w = a[..., 0]
    h = a[..., 1]
    return jnp.stack((x, y, w, h), axis=-1)


def rpn_kernel(x_ref, w1_ref, b1_ref, w2_ref, b2_ref, amul_ref, aadd_ref,
               mask_ref, out_ref, patches_ref, *, ng, na):
    """Single-step kernel: im2col 3x3 conv + LeakyReLU + 1x1 conv + box decode.

    Lane axis = batch-folded flat spatial, PT = nb*ng*ng.  Shapes:
      x_ref:    (C, PT) f32            w1_ref: (3, C, 3*C) bf16 (per-ky chunks)
      b1_ref:   (C, 1) f32             w2_ref: (nout_pad, C) f32
      b2_ref:   (nout_pad, 1) f32      amul_ref: (4*na, PT)  aadd_ref: (2*na, PT)
      mask_ref: (9, PT) f32            out_ref: (nout_pad, PT) f32
      patches_ref (scratch): (3, 3*C, PT) bf16
    """
    C, PT = x_ref.shape
    x = x_ref[...]                                        # (C, PT) f32

    # --- im2col + chunked accumulating conv1 matmul (one chunk per ky row) ---
    acc = None
    for ky in range(3):
        for kx in range(3):
            d = (ky - 1) * ng + (kx - 1)                  # flat spatial shift
            if d == 0:
                tap = x                                   # center tap, no mask
            else:
                t = ky * 3 + kx
                # shifted[l] = x[l + d] for in-image lanes; border/row/batch
                # wrap lanes are zeroed by the precomputed mask, so the lane
                # roll wrap-around is harmless (inputs assumed finite).
                rolled = pltpu.roll(x, (-d) % PT, axis=1)
                tap = rolled * mask_ref[t:t + 1, :]       # (1, PT) broadcast
            patches_ref[ky, kx * C:(kx + 1) * C, :] = tap.astype(jnp.bfloat16)
        # K = 3*C accumulating dot; bf16 x bf16 -> f32 accumulate.
        part = jnp.dot(w1_ref[ky], patches_ref[ky],
                       preferred_element_type=jnp.float32)        # (C, PT)
        acc = part if acc is None else acc + part

    h = acc + b1_ref[...]                                 # conv1 bias
    h = jnp.maximum(h, 0.1 * h)                           # LeakyReLU(0.1)

    # --- 1x1 conv == (nout_pad, C) @ (C, PT) matmul; bias ---
    o = jnp.dot(w2_ref[...], h, preferred_element_type=jnp.float32) + b2_ref[...]

    # --- decode with static 8-aligned row slices (na=4 -> 8/16/24 boundaries):
    #     rows [0:2na] linear, [2na:4na] exp, [4na:] sigmoid (incl. pad rows,
    #     sliced off by the wrapper).
    out_ref[0:2 * na, :] = o[0:2 * na, :] * amul_ref[0:2 * na, :] + aadd_ref[...]
    out_ref[2 * na:4 * na, :] = (jnp.exp(o[2 * na:4 * na, :])
                                 * amul_ref[2 * na:4 * na, :])
    out_ref[4 * na:, :] = jax.nn.sigmoid(o[4 * na:, :])


def _decode_constants(ng, na, P):
    """A_mul (4*na, P) and A_add (2*na, P); row = k*na + a, flat pos = i*ng + j."""
    a_t = anchor_bbox_jax(ANCHOR, ng)                     # (na, ng, ng, 4): x,y,w,h
    P_ = ng * ng
    ax = a_t[..., 0].reshape(na, P_)
    ay = a_t[..., 1].reshape(na, P_)
    aw = a_t[..., 2].reshape(na, P_)
    ah = a_t[..., 3].reshape(na, P_)
    a_mul = jnp.concatenate([aw, ah, aw, ah], axis=0)     # rows k=0..3
    a_add = jnp.concatenate([ax, ay], axis=0)             # rows k=0..1
    return a_mul, a_add


def _tap_masks(ng, P):
    """(9, P) float mask: 1.0 where input position (i+ky-1, j+kx-1) is in-image."""
    ii, jj = jnp.meshgrid(jnp.arange(ng), jnp.arange(ng), indexing="ij")
    masks = []
    for ky in range(3):
        for kx in range(3):
            vi = (ii + ky - 1 >= 0) & (ii + ky - 1 <= ng - 1)
            vj = (jj + kx - 1 >= 0) & (jj + kx - 1 <= ng - 1)
            masks.append((vi & vj).reshape(P))
    return jnp.stack(masks, axis=0).astype(jnp.float32)


@jax.jit
def region_propose_forward(feature_nchw, w1_oihw, b1, w2_oihw, b2):
    """feature_nchw: (nb, C, ng, ng); w1_oihw: (C, C, 3, 3); w2_oihw: (5*na, C, 1, 1).

    Returns proposals (nb, na, ng, ng, 5), matching RegionProposeNet.forward.
    """
    nb, C, ng, _ = feature_nchw.shape
    na = len(ANCHOR)
    P = ng * ng
    PT = nb * P
    nout = 5 * na
    nout_pad = ((nout + 7) // 8) * 8                      # 20 -> 24

    # Static-slice decode & bf16 tap-row alignment assumptions (hold for the
    # module's fixed ANCHOR / feat_depth; fall back to a masked decode if not).
    assert (2 * na) % 8 == 0, "static-slice decode needs 2*na divisible by 8"
    assert C % 16 == 0, "bf16 tap rows need C divisible by 16"

    # --- layout prep (tiny XLA ops, KB scale) -------------------------------
    # Batch folded onto lanes: lane l = b*P + i*ng + j.
    x2 = jnp.transpose(feature_nchw, (1, 0, 2, 3)).reshape(C, PT)
    # conv1 weight, per-ky chunks: w1c[ky, cout, kx*C + cin] = w1[cout, cin, ky, kx]
    w1c = jnp.transpose(w1_oihw, (2, 0, 3, 1)).reshape(3, C, 3 * C).astype(jnp.bfloat16)
    # conv2 weight/bias padded to nout_pad rows (pad rows are zero).
    w2m = jnp.pad(w2_oihw[:, :, 0, 0], ((0, nout_pad - nout), (0, 0)))
    b2p = jnp.pad(b2, (0, nout_pad - nout)).reshape(nout_pad, 1)
    # Decode constants / border masks, tiled along lanes by nb.
    a_mul, a_add = _decode_constants(ng, na, P)
    a_mul = jnp.tile(a_mul, (1, nb))
    a_add = jnp.tile(a_add, (1, nb))
    masks = jnp.tile(_tap_masks(ng, P), (1, nb))

    kernel = functools.partial(rpn_kernel, ng=ng, na=na)
    out = pl.pallas_call(
        kernel,
        out_shape=jax.ShapeDtypeStruct((nout_pad, PT), jnp.float32),
        grid=(1,),
        in_specs=[
            pl.BlockSpec((C, PT), lambda i: (0, 0)),             # activations
            pl.BlockSpec((3, C, 3 * C), lambda i: (0, 0, 0)),    # conv1 weight (bf16)
            pl.BlockSpec((C, 1), lambda i: (0, 0)),              # conv1 bias
            pl.BlockSpec((nout_pad, C), lambda i: (0, 0)),       # conv2 weight (padded)
            pl.BlockSpec((nout_pad, 1), lambda i: (0, 0)),       # conv2 bias (padded)
            pl.BlockSpec((4 * na, PT), lambda i: (0, 0)),        # A_mul
            pl.BlockSpec((2 * na, PT), lambda i: (0, 0)),        # A_add
            pl.BlockSpec((9, PT), lambda i: (0, 0)),             # tap border masks
        ],
        out_specs=pl.BlockSpec((nout_pad, PT), lambda i: (0, 0)),
        scratch_shapes=[pltpu.VMEM((3, 3 * C, PT), jnp.bfloat16)],  # im2col chunks
        compiler_params=pltpu.CompilerParams(dimension_semantics=("arbitrary",)),
    )(x2, w1c, b1.reshape(C, 1), w2m, b2p, a_mul, a_add, masks)

    # (nout_pad, nb*P) -> drop pad rows -> (5, na, nb, ng, ng) -> (nb, na, ng, ng, 5)
    return out[:nout].reshape(5, na, nb, ng, ng).transpose(2, 1, 3, 4, 0)


def reference_forward(feature, w1_t, b1, w2_t, b2):
    """Pure-JAX mirror of the PyTorch forward (torch OIHW weights, NCHW input)."""
    nb, C, ng, _ = feature.shape
    na = len(ANCHOR)
    y = lax.conv_general_dilated(
        feature, w1_t, (1, 1), ((1, 1), (1, 1)),
        dimension_numbers=("NCHW", "OIHW", "NCHW"),
        precision=lax.Precision.HIGHEST) + b1[None, :, None, None]
    y = jnp.where(y > 0, y, 0.1 * y)
    y = lax.conv_general_dilated(
        y, w2_t, (1, 1), ((0, 0), (0, 0)),
        dimension_numbers=("NCHW", "OIHW", "NCHW"),
        precision=lax.Precision.HIGHEST) + b2[None, :, None, None]
    p = y.reshape(nb, 5, na, ng, ng).transpose(0, 2, 3, 4, 1)
    a = anchor_bbox_jax(ANCHOR, ng)
    ax, ay, aw, ah = a[None, ..., 0], a[None, ..., 1], a[None, ..., 2], a[None, ..., 3]
    x = p[..., 0] * aw + ax
    yy = p[..., 1] * ah + ay
    w = jnp.exp(p[..., 2]) * aw
    h = jnp.exp(p[..., 3]) * ah
    obj = jax.nn.sigmoid(p[..., 4])
    return jnp.stack((x, yy, w, h, obj), axis=-1)


if __name__ == "__main__":
    nb, ng = 2, 16
    C = FEAT_DEPTH
    na = len(ANCHOR)

    key = jax.random.PRNGKey(0)
    k1, k2, k3, k4, k5 = jax.random.split(key, 5)
    feature = jax.random.normal(k1, (nb, C, ng, ng), jnp.float32)
    # Deterministic synthetic parameters (torch layouts), small scale so exp() stays tame.
    w1_torch = 0.05 * jax.random.normal(k2, (C, C, 3, 3), jnp.float32)       # OIHW
    b1 = 0.05 * jax.random.normal(k3, (C,), jnp.float32)
    w2_torch = 0.05 * jax.random.normal(k4, (5 * na, C, 1, 1), jnp.float32)  # OIHW
    b2 = 0.05 * jax.random.normal(k5, (5 * na,), jnp.float32)

    proposals = jax.block_until_ready(
        region_propose_forward(feature, w1_torch, b1, w2_torch, b2))
    ref = reference_forward(feature, w1_torch, b1, w2_torch, b2)

    assert proposals.shape == (nb, na, ng, ng, 5), proposals.shape
    err = float(jnp.max(jnp.abs(proposals - ref)))
    # Tolerance documents the bf16 im2col operands (f32 accumulate) vs the
    # HIGHEST-precision f32 reference convs.
    if not jnp.allclose(proposals, ref, rtol=1.5e-2, atol=1.5e-2):
        raise AssertionError(f"kernel/reference mismatch, max abs err {err:e}")
    print("KERNEL_OK")
</pallas_src>

<mosaic_0001>
module attributes {stable_mosaic.version = 11 : i64} {
  func.func @rpn_kernel(%arg0: i32, %arg1: memref<32x512xf32, #tpu.memory_space<vmem>>, %arg2: memref<3x32x96xbf16, #tpu.memory_space<vmem>>, %arg3: memref<32x1xf32, #tpu.memory_space<vmem>>, %arg4: memref<24x32xf32, #tpu.memory_space<vmem>>, %arg5: memref<24x1xf32, #tpu.memory_space<vmem>>, %arg6: memref<16x512xf32, #tpu.memory_space<vmem>>, %arg7: memref<8x512xf32, #tpu.memory_space<vmem>>, %arg8: memref<9x512xf32, #tpu.memory_space<vmem>>, %arg9: memref<24x512xf32, #tpu.memory_space<vmem>>, %arg10: memref<3x96x512xbf16, #tpu.memory_space<vmem>>) attributes {dimension_semantics = [#tpu.dimension_semantics<arbitrary>], iteration_bounds = array<i64: 1>, scalar_prefetch = 0 : i64, scratch_operands = 1 : i64, tpu.core_type = #tpu.core_type<tc>, window_params = [{pipeline_mode = #tpu.pipeline_mode<synchronous>, transform_indices = @transform_0, window_bounds = array<i64: 32, 512>}, {pipeline_mode = #tpu.pipeline_mode<synchronous>, transform_indices = @transform_1, window_bounds = array<i64: 3, 32, 96>}, {pipeline_mode = #tpu.pipeline_mode<synchronous>, transform_indices = @transform_2, window_bounds = array<i64: 32, 1>}, {pipeline_mode = #tpu.pipeline_mode<synchronous>, transform_indices = @transform_3, window_bounds = array<i64: 24, 32>}, {pipeline_mode = #tpu.pipeline_mode<synchronous>, transform_indices = @transform_4, window_bounds = array<i64: 24, 1>}, {pipeline_mode = #tpu.pipeline_mode<synchronous>, transform_indices = @transform_5, window_bounds = array<i64: 16, 512>}, {pipeline_mode = #tpu.pipeline_mode<synchronous>, transform_indices = @transform_6, window_bounds = array<i64: 8, 512>}, {pipeline_mode = #tpu.pipeline_mode<synchronous>, transform_indices = @transform_7, window_bounds = array<i64: 9, 512>}, {pipeline_mode = #tpu.pipeline_mode<synchronous>, transform_indices = @transform_8, window_bounds = array<i64: 24, 512>}]} {
    %c0 = arith.constant 0 : index
    %c0_0 = arith.constant 0 : index
    %0 = vector.load %arg1[%c0, %c0_0] : memref<32x512xf32, #tpu.memory_space<vmem>>, vector<32x512xf32>
    %c17_i32 = arith.constant 17 : i32
    %1 = tpu.dynamic_rotate %0 by %c17_i32 dim 1 : vector<32x512xf32>, i32 -> vector<32x512xf32>
    %c0_1 = arith.constant 0 : index
    %c0_2 = arith.constant 0 : index
    %2 = vector.load %arg8[%c0_1, %c0_2] : memref<9x512xf32, #tpu.memory_space<vmem>>, vector<1x512xf32>
    %3 = vector.broadcast %2 : vector<1x512xf32> to vector<32x512xf32>
    %4 = arith.mulf %1, %3 : vector<32x512xf32>
    %5 = arith.truncf %4 : vector<32x512xf32> to vector<32x512xbf16>
    %c0_3 = arith.constant 0 : index
    %c0_4 = arith.constant 0 : index
    %c0_5 = arith.constant 0 : index
    %6 = vector.load %arg10[%c0_3, %c0_4, %c0_5] : memref<3x96x512xbf16, #tpu.memory_space<vmem>>, vector<1x32x512xbf16>
    %7 = vector.shape_cast %6 : vector<1x32x512xbf16> to vector<32x512xbf16>
    %8 = vector.shape_cast %5 : vector<32x512xbf16> to vector<1x32x512xbf16>
    tpu.vector_store %arg10[%c0_3, %c0_4, %c0_5], %8 {strides = array<i32>} : memref<3x96x512xbf16, #tpu.memory_space<vmem>>, vector<1x32x512xbf16>,
    %c16_i32 = arith.constant 16 : i32
    %9 = tpu.dynamic_rotate %0 by %c16_i32 dim 1 : vector<32x512xf32>, i32 -> vector<32x512xf32>
    %c1 = arith.constant 1 : index
    %c0_6 = arith.constant 0 : index
    %10 = vector.load %arg8[%c1, %c0_6] : memref<9x512xf32, #tpu.memory_space<vmem>>, vector<1x512xf32>
    %11 = vector.broadcast %10 : vector<1x512xf32> to vector<32x512xf32>
    %12 = arith.mulf %9, %11 : vector<32x512xf32>
    %13 = arith.truncf %12 : vector<32x512xf32> to vector<32x512xbf16>
    %c0_7 = arith.constant 0 : index
    %c32 = arith.constant 32 : index
    %c0_8 = arith.constant 0 : index
    %14 = vector.load %arg10[%c0_7, %c32, %c0_8] : memref<3x96x512xbf16, #tpu.memory_space<vmem>>, vector<1x32x512xbf16>
    %15 = vector.shape_cast %14 : vector<1x32x512xbf16> to vector<32x512xbf16>
    %16 = vector.shape_cast %13 : vector<32x512xbf16> to vector<1x32x512xbf16>
    tpu.vector_store %arg10[%c0_7, %c32, %c0_8], %16 {strides = array<i32>} : memref<3x96x512xbf16, #tpu.memory_space<vmem>>, vector<1x32x512xbf16>,
    %c15_i32 = arith.constant 15 : i32
    %17 = tpu.dynamic_rotate %0 by %c15_i32 dim 1 : vector<32x512xf32>, i32 -> vector<32x512xf32>
    %c2 = arith.constant 2 : index
    %c0_9 = arith.constant 0 : index
    %18 = vector.load %arg8[%c2, %c0_9] : memref<9x512xf32, #tpu.memory_space<vmem>>, vector<1x512xf32>
    %19 = vector.broadcast %18 : vector<1x512xf32> to vector<32x512xf32>
    %20 = arith.mulf %17, %19 : vector<32x512xf32>
    %21 = arith.truncf %20 : vector<32x512xf32> to vector<32x512xbf16>
    %c0_10 = arith.constant 0 : index
    %c64 = arith.constant 64 : index
    %c0_11 = arith.constant 0 : index
    %22 = vector.load %arg10[%c0_10, %c64, %c0_11] : memref<3x96x512xbf16, #tpu.memory_space<vmem>>, vector<1x32x512xbf16>
    %23 = vector.shape_cast %22 : vector<1x32x512xbf16> to vector<32x512xbf16>
    %24 = vector.shape_cast %21 : vector<32x512xbf16> to vector<1x32x512xbf16>
    tpu.vector_store %arg10[%c0_10, %c64, %c0_11], %24 {strides = array<i32>} : memref<3x96x512xbf16, #tpu.memory_space<vmem>>, vector<1x32x512xbf16>,
    %c0_12 = arith.constant 0 : index
    %c0_13 = arith.constant 0 : index
    %c0_14 = arith.constant 0 : index
    %25 = vector.load %arg2[%c0_12, %c0_13, %c0_14] : memref<3x32x96xbf16, #tpu.memory_space<vmem>>, vector<1x32x96xbf16>
    %26 = vector.shape_cast %25 : vector<1x32x96xbf16> to vector<32x96xbf16>
    %c0_15 = arith.constant 0 : index
    %c0_16 = arith.constant 0 : index
    %c0_17 = arith.constant 0 : index
    %27 = vector.load %arg10[%c0_15, %c0_16, %c0_17] : memref<3x96x512xbf16, #tpu.memory_space<vmem>>, vector<1x96x512xbf16>
    %28 = vector.shape_cast %27 : vector<1x96x512xbf16> to vector<96x512xbf16>
    %cst = arith.constant dense<0.000000e+00> : vector<32x512xf32>
    %29 = tpu.matmul %26, %28, %cst {dimension_numbers = #tpu.dot_dimension_numbers<[1], [0], [0], [1], [0, 0, 1, 1], [], []>} : vector<32x96xbf16>, vector<96x512xbf16>, vector<32x512xf32> -> vector<32x512xf32>
    %c1_i32 = arith.constant 1 : i32
    %30 = tpu.dynamic_rotate %0 by %c1_i32 dim 1 : vector<32x512xf32>, i32 -> vector<32x512xf32>
    %c3 = arith.constant 3 : index
    %c0_18 = arith.constant 0 : index
    %31 = vector.load %arg8[%c3, %c0_18] : memref<9x512xf32, #tpu.memory_space<vmem>>, vector<1x512xf32>
    %32 = vector.broadcast %31 : vector<1x512xf32> to vector<32x512xf32>
    %33 = arith.mulf %30, %32 : vector<32x512xf32>
    %34 = arith.truncf %33 : vector<32x512xf32> to vector<32x512xbf16>
    %c1_19 = arith.constant 1 : index
    %c0_20 = arith.constant 0 : index
    %c0_21 = arith.constant 0 : index
    %35 = vector.load %arg10[%c1_19, %c0_20, %c0_21] : memref<3x96x512xbf16, #tpu.memory_space<vmem>>, vector<1x32x512xbf16>
    %36 = vector.shape_cast %35 : vector<1x32x512xbf16> to vector<32x512xbf16>
    %37 = vector.shape_cast %34 : vector<32x512xbf16> to vector<1x32x512xbf16>
    tpu.vector_store %arg10[%c1_19, %c0_20, %c0_21], %37 {strides = array<i32>} : memref<3x96x512xbf16, #tpu.memory_space<vmem>>, vector<1x32x512xbf16>,
    %38 = arith.truncf %0 : vector<32x512xf32> to vector<32x512xbf16>
    %c1_22 = arith.constant 1 : index
    %c32_23 = arith.constant 32 : index
    %c0_24 = arith.constant 0 : index
    %39 = vector.load %arg10[%c1_22, %c32_23, %c0_24] : memref<3x96x512xbf16, #tpu.memory_space<vmem>>, vector<1x32x512xbf16>
    %40 = vector.shape_cast %39 : vector<1x32x512xbf16> to vector<32x512xbf16>
    %41 = vector.shape_cast %38 : vector<32x512xbf16> to vector<1x32x512xbf16>
    tpu.vector_store %arg10[%c1_22, %c32_23, %c0_24], %41 {strides = array<i32>} : memref<3x96x512xbf16, #tpu.memory_space<vmem>>, vector<1x32x512xbf16>,
    %c511_i32 = arith.constant 511 : i32
    %42 = tpu.dynamic_rotate %0 by %c511_i32 dim 1 : vector<32x512xf32>, i32 -> vector<32x512xf32>
    %c5 = arith.constant 5 : index
    %c0_25 = arith.constant 0 : index
    %43 = vector.load %arg8[%c5, %c0_25] : memref<9x512xf32, #tpu.memory_space<vmem>>, vector<1x512xf32>
    %44 = vector.broadcast %43 : vector<1x512xf32> to vector<32x512xf32>
    %45 = arith.mulf %42, %44 : vector<32x512xf32>
    %46 = arith.truncf %45 : vector<32x512xf32> to vector<32x512xbf16>
    %c1_26 = arith.constant 1 : index
    %c64_27 = arith.constant 64 : index
    %c0_28 = arith.constant 0 : index
    %47 = vector.load %arg10[%c1_26, %c64_27, %c0_28] : memref<3x96x512xbf16, #tpu.memory_space<vmem>>, vector<1x32x512xbf16>
    %48 = vector.shape_cast %47 : vector<1x32x512xbf16> to vector<32x512xbf16>
    %49 = vector.shape_cast %46 : vector<32x512xbf16> to vector<1x32x512xbf16>
    tpu.vector_store %arg10[%c1_26, %c64_27, %c0_28], %49 {strides = array<i32>} : memref<3x96x512xbf16, #tpu.memory_space<vmem>>, vector<1x32x512xbf16>,
    %c1_29 = arith.constant 1 : index
    %c0_30 = arith.constant 0 : index
    %c0_31 = arith.constant 0 : index
    %50 = vector.load %arg2[%c1_29, %c0_30, %c0_31] : memref<3x32x96xbf16, #tpu.memory_space<vmem>>, vector<1x32x96xbf16>
    %51 = vector.shape_cast %50 : vector<1x32x96xbf16> to vector<32x96xbf16>
    %c1_32 = arith.constant 1 : index
    %c0_33 = arith.constant 0 : index
    %c0_34 = arith.constant 0 : index
    %52 = vector.load %arg10[%c1_32, %c0_33, %c0_34] : memref<3x96x512xbf16, #tpu.memory_space<vmem>>, vector<1x96x512xbf16>
    %53 = vector.shape_cast %52 : vector<1x96x512xbf16> to vector<96x512xbf16>
    %cst_35 = arith.constant dense<0.000000e+00> : vector<32x512xf32>
    %54 = tpu.matmul %51, %53, %cst_35 {dimension_numbers = #tpu.dot_dimension_numbers<[1], [0], [0], [1], [0, 0, 1, 1], [], []>} : vector<32x96xbf16>, vector<96x512xbf16>, vector<32x512xf32> -> vector<32x512xf32>
    %55 = arith.addf %29, %54 : vector<32x512xf32>
    %c497_i32 = arith.constant 497 : i32
    %56 = tpu.dynamic_rotate %0 by %c497_i32 dim 1 : vector<32x512xf32>, i32 -> vector<32x512xf32>
    %c6 = arith.constant 6 : index
    %c0_36 = arith.constant 0 : index
    %57 = vector.load %arg8[%c6, %c0_36] : memref<9x512xf32, #tpu.memory_space<vmem>>, vector<1x512xf32>
    %58 = vector.broadcast %57 : vector<1x512xf32> to vector<32x512xf32>
    %59 = arith.mulf %56, %58 : vector<32x512xf32>
    %60 = arith.truncf %59 : vector<32x512xf32> to vector<32x512xbf16>
    %c2_37 = arith.constant 2 : index
    %c0_38 = arith.constant 0 : index
    %c0_39 = arith.constant 0 : index
    %61 = vector.load %arg10[%c2_37, %c0_38, %c0_39] : memref<3x96x512xbf16, #tpu.memory_space<vmem>>, vector<1x32x512xbf16>
    %62 = vector.shape_cast %61 : vector<1x32x512xbf16> to vector<32x512xbf16>
    %63 = vector.shape_cast %60 : vector<32x512xbf16> to vector<1x32x512xbf16>
    tpu.vector_store %arg10[%c2_37, %c0_38, %c0_39], %63 {strides = array<i32>} : memref<3x96x512xbf16, #tpu.memory_space<vmem>>, vector<1x32x512xbf16>,
    %c496_i32 = arith.constant 496 : i32
    %64 = tpu.dynamic_rotate %0 by %c496_i32 dim 1 : vector<32x512xf32>, i32 -> vector<32x512xf32>
    %c7 = arith.constant 7 : index
    %c0_40 = arith.constant 0 : index
    %65 = vector.load %arg8[%c7, %c0_40] : memref<9x512xf32, #tpu.memory_space<vmem>>, vector<1x512xf32>
    %66 = vector.broadcast %65 : vector<1x512xf32> to vector<32x512xf32>
    %67 = arith.mulf %64, %66 : vector<32x512xf32>
    %68 = arith.truncf %67 : vector<32x512xf32> to vector<32x512xbf16>
    %c2_41 = arith.constant 2 : index
    %c32_42 = arith.constant 32 : index
    %c0_43 = arith.constant 0 : index
    %69 = vector.load %arg10[%c2_41, %c32_42, %c0_43] : memref<3x96x512xbf16, #tpu.memory_space<vmem>>, vector<1x32x512xbf16>
    %70 = vector.shape_cast %69 : vector<1x32x512xbf16> to vector<32x512xbf16>
    %71 = vector.shape_cast %68 : vector<32x512xbf16> to vector<1x32x512xbf16>
    tpu.vector_store %arg10[%c2_41, %c32_42, %c0_43], %71 {strides = array<i32>} : memref<3x96x512xbf16, #tpu.memory_space<vmem>>, vector<1x32x512xbf16>,
    %c495_i32 = arith.constant 495 : i32
    %72 = tpu.dynamic_rotate %0 by %c495_i32 dim 1 : vector<32x512xf32>, i32 -> vector<32x512xf32>
    %c8 = arith.constant 8 : index
    %c0_44 = arith.constant 0 : index
    %73 = vector.load %arg8[%c8, %c0_44] : memref<9x512xf32, #tpu.memory_space<vmem>>, vector<1x512xf32>
    %74 = vector.broadcast %73 : vector<1x512xf32> to vector<32x512xf32>
    %75 = arith.mulf %72, %74 : vector<32x512xf32>
    %76 = arith.truncf %75 : vector<32x512xf32> to vector<32x512xbf16>
    %c2_45 = arith.constant 2 : index
    %c64_46 = arith.constant 64 : index
    %c0_47 = arith.constant 0 : index
    %77 = vector.load %arg10[%c2_45, %c64_46, %c0_47] : memref<3x96x512xbf16, #tpu.memory_space<vmem>>, vector<1x32x512xbf16>
    %78 = vector.shape_cast %77 : vector<1x32x512xbf16> to vector<32x512xbf16>
    %79 = vector.shape_cast %76 : vector<32x512xbf16> to vector<1x32x512xbf16>
    tpu.vector_store %arg10[%c2_45, %c64_46, %c0_47], %79 {strides = array<i32>} : memref<3x96x512xbf16, #tpu.memory_space<vmem>>, vector<1x32x512xbf16>,
    %c2_48 = arith.constant 2 : index
    %c0_49 = arith.constant 0 : index
    %c0_50 = arith.constant 0 : index
    %80 = vector.load %arg2[%c2_48, %c0_49, %c0_50] : memref<3x32x96xbf16, #tpu.memory_space<vmem>>, vector<1x32x96xbf16>
    %81 = vector.shape_cast %80 : vector<1x32x96xbf16> to vector<32x96xbf16>
    %c2_51 = arith.constant 2 : index
    %c0_52 = arith.constant 0 : index
    %c0_53 = arith.constant 0 : index
    %82 = vector.load %arg10[%c2_51, %c0_52, %c0_53] : memref<3x96x512xbf16, #tpu.memory_space<vmem>>, vector<1x96x512xbf16>
    %83 = vector.shape_cast %82 : vector<1x96x512xbf16> to vector<96x512xbf16>
    %cst_54 = arith.constant dense<0.000000e+00> : vector<32x512xf32>
    %84 = tpu.matmul %81, %83, %cst_54 {dimension_numbers = #tpu.dot_dimension_numbers<[1], [0], [0], [1], [0, 0, 1, 1], [], []>} : vector<32x96xbf16>, vector<96x512xbf16>, vector<32x512xf32> -> vector<32x512xf32>
    %85 = arith.addf %55, %84 : vector<32x512xf32>
    %c0_55 = arith.constant 0 : index
    %c0_56 = arith.constant 0 : index
    %86 = vector.load %arg3[%c0_55, %c0_56] : memref<32x1xf32, #tpu.memory_space<vmem>>, vector<32x1xf32>
    %87 = vector.broadcast %86 : vector<32x1xf32> to vector<32x512xf32>
    %88 = arith.addf %85, %87 : vector<32x512xf32>
    %cst_57 = arith.constant 1.000000e-01 : f32
    %89 = vector.broadcast %cst_57 : f32 to vector<32x512xf32>
    %90 = arith.mulf %89, %88 : vector<32x512xf32>
    %91 = arith.maximumf %88, %90 : vector<32x512xf32>
    %c0_58 = arith.constant 0 : index
    %c0_59 = arith.constant 0 : index
    %92 = vector.load %arg4[%c0_58, %c0_59] : memref<24x32xf32, #tpu.memory_space<vmem>>, vector<24x32xf32>
    %cst_60 = arith.constant dense<0.000000e+00> : vector<24x512xf32>
    %93 = tpu.matmul %92, %91, %cst_60 {dimension_numbers = #tpu.dot_dimension_numbers<[1], [0], [0], [1], [0, 0, 1, 1], [], []>} : vector<24x32xf32>, vector<32x512xf32>, vector<24x512xf32> -> vector<24x512xf32>
    %c0_61 = arith.constant 0 : index
    %c0_62 = arith.constant 0 : index
    %94 = vector.load %arg5[%c0_61, %c0_62] : memref<24x1xf32, #tpu.memory_space<vmem>>, vector<24x1xf32>
    %95 = vector.broadcast %94 : vector<24x1xf32> to vector<24x512xf32>
    %96 = arith.addf %93, %95 : vector<24x512xf32>
    %97 = vector.extract_strided_slice %96 {offsets = [0, 0], sizes = [8, 512], strides = [1, 1]} : vector<24x512xf32> to vector<8x512xf32>
    %c0_63 = arith.constant 0 : index
    %c0_64 = arith.constant 0 : index
    %98 = vector.load %arg6[%c0_63, %c0_64] : memref<16x512xf32, #tpu.memory_space<vmem>>, vector<8x512xf32>
    %99 = arith.mulf %97, %98 : vector<8x512xf32>
    %c0_65 = arith.constant 0 : index
    %c0_66 = arith.constant 0 : index
    %100 = vector.load %arg7[%c0_65, %c0_66] : memref<8x512xf32, #tpu.memory_space<vmem>>, vector<8x512xf32>
    %101 = arith.addf %99, %100 : vector<8x512xf32>
    %c0_67 = arith.constant 0 : index
    %c0_68 = arith.constant 0 : index
    %102 = vector.load %arg9[%c0_67, %c0_68] : memref<24x512xf32, #tpu.memory_space<vmem>>, vector<8x512xf32>
    tpu.vector_store %arg9[%c0_67, %c0_68], %101 {strides = array<i32>} : memref<24x512xf32, #tpu.memory_space<vmem>>, vector<8x512xf32>,
    %103 = vector.extract_strided_slice %96 {offsets = [8, 0], sizes = [8, 512], strides = [1, 1]} : vector<24x512xf32> to vector<8x512xf32>
    %104 = math.exp %103 : vector<8x512xf32>
    %c8_69 = arith.constant 8 : index
    %c0_70 = arith.constant 0 : index
    %105 = vector.load %arg6[%c8_69, %c0_70] : memref<16x512xf32, #tpu.memory_space<vmem>>, vector<8x512xf32>
    %106 = arith.mulf %104, %105 : vector<8x512xf32>
    %c8_71 = arith.constant 8 : index
    %c0_72 = arith.constant 0 : index
    %107 = vector.load %arg9[%c8_71, %c0_72] : memref<24x512xf32, #tpu.memory_space<vmem>>, vector<8x512xf32>
    tpu.vector_store %arg9[%c8_71, %c0_72], %106 {strides = array<i32>} : memref<24x512xf32, #tpu.memory_space<vmem>>, vector<8x512xf32>,
    %108 = vector.extract_strided_slice %96 {offsets = [16, 0], sizes = [8, 512], strides = [1, 1]} : vector<24x512xf32> to vector<8x512xf32>
    %109 = arith.negf %108 : vector<8x512xf32>
    %110 = math.exp %109 : vector<8x512xf32>
    %cst_73 = arith.constant 1.000000e+00 : f32
    %111 = vector.broadcast %cst_73 : f32 to vector<8x512xf32>
    %112 = arith.addf %111, %110 : vector<8x512xf32>
    %113 = arith.divf %111, %112 : vector<8x512xf32>
    %c16 = arith.constant 16 : index
    %c0_74 = arith.constant 0 : index
    %114 = vector.load %arg9[%c16, %c0_74] : memref<24x512xf32, #tpu.memory_space<vmem>>, vector<8x512xf32>
    tpu.vector_store %arg9[%c16, %c0_74], %113 {strides = array<i32>} : memref<24x512xf32, #tpu.memory_space<vmem>>, vector<8x512xf32>,
    return
  }
  func.func @transform_0(%arg0: i32) -> (i32, i32) {
    %c0_i32 = arith.constant 0 : i32
    %c0_i32_0 = arith.constant 0 : i32
    %c0_i32_1 = arith.constant 0 : i32
    return %c0_i32, %c0_i32_0 : i32, i32
  }
  func.func @transform_1(%arg0: i32) -> (i32, i32, i32) {
    %c0_i32 = arith.constant 0 : i32
    %c0_i32_0 = arith.constant 0 : i32
    %c0_i32_1 = arith.constant 0 : i32
    %c0_i32_2 = arith.constant 0 : i32
    return %c0_i32, %c0_i32_0, %c0_i32_1 : i32, i32, i32
  }
  func.func @transform_2(%arg0: i32) -> (i32, i32) {
    %c0_i32 = arith.constant 0 : i32
    %c0_i32_0 = arith.constant 0 : i32
    %c0_i32_1 = arith.constant 0 : i32
    return %c0_i32, %c0_i32_0 : i32, i32
  }
  func.func @transform_3(%arg0: i32) -> (i32, i32) {
    %c0_i32 = arith.constant 0 : i32
    %c0_i32_0 = arith.constant 0 : i32
    %c0_i32_1 = arith.constant 0 : i32
    return %c0_i32, %c0_i32_0 : i32, i32
  }
  func.func @transform_4(%arg0: i32) -> (i32, i32) {
    %c0_i32 = arith.constant 0 : i32
    %c0_i32_0 = arith.constant 0 : i32
    %c0_i32_1 = arith.constant 0 : i32
    return %c0_i32, %c0_i32_0 : i32, i32
  }
  func.func @transform_5(%arg0: i32) -> (i32, i32) {
    %c0_i32 = arith.constant 0 : i32
    %c0_i32_0 = arith.constant 0 : i32
    %c0_i32_1 = arith.constant 0 : i32
    return %c0_i32, %c0_i32_0 : i32, i32
  }
  func.func @transform_6(%arg0: i32) -> (i32, i32) {
    %c0_i32 = arith.constant 0 : i32
    %c0_i32_0 = arith.constant 0 : i32
    %c0_i32_1 = arith.constant 0 : i32
    return %c0_i32, %c0_i32_0 : i32, i32
  }
  func.func @transform_7(%arg0: i32) -> (i32, i32) {
    %c0_i32 = arith.constant 0 : i32
    %c0_i32_0 = arith.constant 0 : i32
    %c0_i32_1 = arith.constant 0 : i32
    return %c0_i32, %c0_i32_0 : i32, i32
  }
  func.func @transform_8(%arg0: i32) -> (i32, i32) {
    %c0_i32 = arith.constant 0 : i32
    %c0_i32_0 = arith.constant 0 : i32
    %c0_i32_1 = arith.constant 0 : i32
    return %c0_i32, %c0_i32_0 : i32, i32
  }
}

</mosaic_0001>

<bundles_post_ra>
// kernel: region_propose_forward.1
= control target key start
LH: loop header
LB: loop body
LE: loop exit
PB: predicated region body
PF: predicated region fallthrough
CT: control target
= control target key end

     0   :  { %s1840_s9 = smov 1   ;;  %s1841_s17 = smov 127   ;;  %v1843_v16 = vmov 0   ;;  %v78_v17 = vlaneseq  ;;  %vm651_vm2 = vcmask 785408   ;;  %vm1459_vm9 = vcmask 261120   ;;  %s2687_s0 = inlined_call_operand.vmem [shape: f32[32,512], index: 0, kind: input, shape index: {}]   ;;  %s2688_s1 = inlined_call_operand.vmem [shape: bf16[3,32,96], index: 1, kind: input, shape index: {}]   ;;  %s2689_s7 = inlined_call_operand.vmem [shape: f32[9,512], index: 7, kind: input, shape index: {}]   ;;  %s2690_s2 = inlined_call_operand.vmem [shape: f32[32,1], index: 2, kind: input, shape index: {}]   ;;  %s2691_s4 = inlined_call_operand.vmem [shape: f32[24,1], index: 4, kind: input, shape index: {}]   ;;  %s2692_s3 = inlined_call_operand.vmem [shape: f32[24,32], index: 3, kind: input, shape index: {}]   ;;  %s2693_s5 = inlined_call_operand.vmem [shape: f32[16,512], index: 5, kind: input, shape index: {}]   ;;  %s2694_s6 = inlined_call_operand.vmem [shape: f32[8,512], index: 6, kind: input, shape index: {}]   ;;  %s2695_s8 = inlined_call_operand.vmem [shape: f32[24,512], index: 8, kind: output, shape index: {}]  }
   0x1   :  { %v1898_v0 = vld [vmem:[%s2687_s0 + $0x8] sm:$0xff]  ;;  %v1903_v1 = vld [vmem:[%s2687_s0] sm:$0xff]  ;;  %v1922_v4 = vld [vmem:[%s2687_s0 + $0x30] sm:$0xff]  ;;  %690 = vmatprep.mubr.bf16.mxu0 %v1843_v16  ;;  %743 = vmatprep.mubr.bf16.mxu1 %v1843_v16  ;;  %s1845_s20 = smov 15   ;;  %s1846_s23 = smov 113  }
   0x2   :  { %395 = vrot.lane.b32.xlu1 %v1898_v0, %s1840_s9  ;;  %387 = vrot.lane.b32.xlu0 %v1903_v1, %s1840_s9  ;;  %v1910_v2 = vld [vmem:[%s2687_s0 + $0x28] sm:$0xff]  ;;  %v1915_v3 = vld [vmem:[%s2687_s0 + $0x20] sm:$0xff]  ;;  %v100_v18 = vshrl.u32 %v78_v17, 7  ;;  %v2043_v19 = vand.u32 127, %v78_v17  ;;  %s1847_s30 = smov 112   ;;  %s1848_s12 = smov 111  }
   0x3   :  { %v1927_v5 = vld [vmem:[%s2687_s0 + $0x10] sm:$0xff]  ;;  %v1934_v6 = vld [vmem:[%s2687_s0 + $0x38] sm:$0xff]  ;;  %v1946_v8 = vld [vmem:[%s2687_s0 + $0x60] sm:$0xff]  ;;  %1809 = vset.pattern.permute.xlu1 %v1843_v16  ;;  %1808 = vset.pattern.permute.xlu0 %v1843_v16 }
   0x4   :  { %v1939_v7 = vld [vmem:[%s2687_s0 + $0x18] sm:$0xff]  ;;  %v1951_v9 = vld [vmem:[%s2687_s0 + $0x40] sm:$0xff]  ;;  %v1958_v10 = vld [vmem:[%s2687_s0 + $0x68] sm:$0xff]  ;;  %v2049_v20 = vsub.s32 1, %v100_v18  ;;  %vm419_vm0 = vcmp.lt.s32.totalorder %v2043_v19, 1  ;;  %v2062_v28 = vsub.s32 2, %v100_v18 }
   0x5   :  { %v1963_v11 = vld [vmem:[%s2687_s0 + $0x48] sm:$0xff]  ;;  %v1970_v12 = vld [vmem:[%s2687_s0 + $0x70] sm:$0xff]  ;;  %v1982_v14 = vld [vmem:[%s2687_s0 + $0x78] sm:$0xff]  ;;  %v2070_v32 = vsub.s32 0, %v100_v18  ;;  %v2072_v33 = vsub.s32 3, %v100_v18  ;;  %vm540_vm1 = vcmp.lt.s32.totalorder %v2043_v19, 127 }
   0x6   :  { %397 = vrot.lane.b32.xlu1 %v1910_v2, %s1840_s9  ;;  %389 = vrot.lane.b32.xlu0 %v1915_v3, %s1840_s9  ;;  %v1975_v13 = vld [vmem:[%s2687_s0 + $0x50] sm:$0xff]  ;;  %v1987_v15 = vld [vmem:[%s2687_s0 + $0x58] sm:$0xff]  ;;  %s1842_s0 = smov 17   ;;  %vm80_vm3 = vcmp.lt.s32.totalorder %v2043_v19, 17  ;;  %vm183_vm4 = vcmp.lt.s32.totalorder %v2043_v19, 16  ;;  %vm287_vm5 = vcmp.lt.s32.totalorder %v2043_v19, 15 }
   0x7   :  { %v1709_v21 = vld [vmem:[%s2689_s7 + $0x3] ss:$8 sm:$0xf]  ;;  %vm918_vm6 = vcmp.lt.s32.totalorder %v2043_v19, 113  ;;  %vm1023_vm7 = vcmp.lt.s32.totalorder %v2043_v19, 112  ;;  %vm1127_vm8 = vcmp.lt.s32.totalorder %v2043_v19, 111 }
   0x8   :  { %v446_v24 = vrot.slane %v1709_v21, %v2049_v20  ;;  %v450_v37 = vrot.slane %v1709_v21, %v2062_v28  ;;  %v442_v40 = vrot.slane %v1709_v21, %v2070_v32  ;;  %v454_v41 = vrot.slane %v1709_v21, %v2072_v33  ;;  %v1815_v19 = vld [vmem:[%s2688_s1 + $0x28] sm:$0xff]  }
   0xa   :  { %405 = vrot.lane.b32.xlu1 %v1922_v4, %s1840_s9  ;;  %403 = vrot.lane.b32.xlu0 %v1927_v5, %s1840_s9 }
   0xe   :  { %413 = vrot.lane.b32.xlu1 %v1934_v6, %s1840_s9  ;;  %411 = vrot.lane.b32.xlu0 %v1939_v7, %s1840_s9 }
  0x12   :  { %393 = vrot.lane.b32.xlu1 %v1946_v8, %s1840_s9  ;;  %391 = vrot.lane.b32.xlu0 %v1951_v9, %s1840_s9 }
  0x16   :  { %401 = vrot.lane.b32.xlu1 %v1958_v10, %s1840_s9  ;;  %399 = vrot.lane.b32.xlu0 %v1963_v11, %s1840_s9 }
  0x1a   :  { %409 = vrot.lane.b32.xlu1 %v1970_v12, %s1840_s9  ;;  %407 = vrot.lane.b32.xlu0 %v1975_v13, %s1840_s9 }
  0x1e   :  { %417 = vrot.lane.b32.xlu1 %v1982_v14, %s1840_s9  ;;  %415 = vrot.lane.b32.xlu0 %v1987_v15, %s1840_s9  ;;  %s1844_s9 = smov 16  }
  0x22   :  { %510 = vrot.lane.b32.xlu1 %v1915_v3, %s1841_s17  ;;  %508 = vrot.lane.b32.xlu0 %v1903_v1, %s1841_s17 }
  0x26   :  { %518 = vrot.lane.b32.xlu1 %v1910_v2, %s1841_s17  ;;  %516 = vrot.lane.b32.xlu0 %v1898_v0, %s1841_s17 }
  0x2a   :  { %526 = vrot.lane.b32.xlu1 %v1922_v4, %s1841_s17  ;;  %524 = vrot.lane.b32.xlu0 %v1927_v5, %s1841_s17 }
  0x2e   :  { %534 = vrot.lane.b32.xlu1 %v1934_v6, %s1841_s17  ;;  %532 = vrot.lane.b32.xlu0 %v1939_v7, %s1841_s17 }
  0x32   :  { %514 = vrot.lane.b32.xlu1 %v1946_v8, %s1841_s17  ;;  %512 = vrot.lane.b32.xlu0 %v1951_v9, %s1841_s17 }
  0x36   :  { %522 = vrot.lane.b32.xlu1 %v1958_v10, %s1841_s17  ;;  %520 = vrot.lane.b32.xlu0 %v1963_v11, %s1841_s17 }
  0x3a   :  { %530 = vrot.lane.b32.xlu1 %v1970_v12, %s1841_s17  ;;  %528 = vrot.lane.b32.xlu0 %v1975_v13, %s1841_s17 }
  0x3e   :  { %538 = vrot.lane.b32.xlu1 %v1982_v14, %s1841_s17  ;;  %536 = vrot.lane.b32.xlu0 %v1987_v15, %s1841_s17 }
  0x42   :  { %48 = vrot.lane.b32.xlu1 %v1915_v3, %s1842_s0  ;;  %46 = vrot.lane.b32.xlu0 %v1903_v1, %s1842_s0 }
  0x46   :  { %56 = vrot.lane.b32.xlu1 %v1910_v2, %s1842_s0  ;;  %54 = vrot.lane.b32.xlu0 %v1898_v0, %s1842_s0 }
  0x4a   :  { %64 = vrot.lane.b32.xlu1 %v1922_v4, %s1842_s0  ;;  %62 = vrot.lane.b32.xlu0 %v1927_v5, %s1842_s0 }
  0x4e   :  { %72 = vrot.lane.b32.xlu1 %v1934_v6, %s1842_s0  ;;  %70 = vrot.lane.b32.xlu0 %v1939_v7, %s1842_s0 }
  0x52   :  { %52 = vrot.lane.b32.xlu1 %v1946_v8, %s1842_s0  ;;  %50 = vrot.lane.b32.xlu0 %v1951_v9, %s1842_s0 }
  0x56   :  { %60 = vrot.lane.b32.xlu1 %v1958_v10, %s1842_s0  ;;  %58 = vrot.lane.b32.xlu0 %v1963_v11, %s1842_s0 }
  0x5a   :  { %68 = vrot.lane.b32.xlu1 %v1970_v12, %s1842_s0  ;;  %66 = vrot.lane.b32.xlu0 %v1975_v13, %s1842_s0 }
  0x5e   :  { %76 = vrot.lane.b32.xlu1 %v1982_v14, %s1842_s0  ;;  %74 = vrot.lane.b32.xlu0 %v1987_v15, %s1842_s0 }
  0x62   :  { %153 = vrot.lane.b32.xlu1 %v1915_v3, %s1844_s9  ;;  %151 = vrot.lane.b32.xlu0 %v1903_v1, %s1844_s9 }
  0x66   :  { %161 = vrot.lane.b32.xlu1 %v1910_v2, %s1844_s9  ;;  %159 = vrot.lane.b32.xlu0 %v1898_v0, %s1844_s9 }
  0x6a   :  { %169 = vrot.lane.b32.xlu1 %v1922_v4, %s1844_s9  ;;  %167 = vrot.lane.b32.xlu0 %v1927_v5, %s1844_s9 }
  0x6e   :  { %177 = vrot.lane.b32.xlu1 %v1934_v6, %s1844_s9  ;;  %175 = vrot.lane.b32.xlu0 %v1939_v7, %s1844_s9 }
  0x72   :  { %157 = vrot.lane.b32.xlu1 %v1946_v8, %s1844_s9  ;;  %155 = vrot.lane.b32.xlu0 %v1951_v9, %s1844_s9 }
  0x74   :  { %v396_v22 = vpop.permute.xlu1 %395  ;;  %v388_v23 = vpop.permute.xlu0 %387 }
  0x75   :  { %v428_v25 = vsel %vm419_vm0, %v388_v23, %v396_v22 }
  0x76   :  { %165 = vrot.lane.b32.xlu1 %v1958_v10, %s1844_s9  ;;  %163 = vrot.lane.b32.xlu0 %v1963_v11, %s1844_s9  ;;  %v460_v30 = vmul.f32 %v446_v24, %v428_v25 }
  0x78   :  { %v398_v26 = vpop.permute.xlu1 %397  ;;  %v390_v27 = vpop.permute.xlu0 %389 }
  0x79   :  { %v429_v29 = vsel %vm419_vm0, %v390_v27, %v398_v26 }
  0x7a   :  { %173 = vrot.lane.b32.xlu1 %v1970_v12, %s1844_s9  ;;  %171 = vrot.lane.b32.xlu0 %v1975_v13, %s1844_s9  ;;  %v464_v31 = vmul.f32 %v446_v24, %v429_v29 }
  0x7c   :  { %v406_v34 = vpop.permute.xlu1 %405  ;;  %v404_v35 = vpop.permute.xlu0 %403  ;;  %v476_v36 = vpack.c.bf16 %v464_v31, %v460_v30 }
  0x7d   :  { %v425_v38 = vsel %vm419_vm0, %v398_v26, %v406_v34  ;;  %v424_v39 = vsel %vm419_vm0, %v396_v22, %v404_v35 }
  0x7e   :  { %181 = vrot.lane.b32.xlu1 %v1982_v14, %s1844_s9  ;;  %179 = vrot.lane.b32.xlu0 %v1987_v15, %s1844_s9  ;;  %v461_v44 = vmul.f32 %v450_v37, %v424_v39  ;;  %v465_v45 = vmul.f32 %v450_v37, %v425_v38 }
  0x7f   :  { %658 = vmatprep.subr.bf16.mxu0 %v476_v36 }
  0x80   :  { %v414_v42 = vpop.permute.xlu1 %413  ;;  %v412_v43 = vpop.permute.xlu0 %411  ;;  %v477_v58 = vpack.c.bf16 %v465_v45, %v461_v44 }
  0x81   :  { %v433_v46 = vsel %vm419_vm0, %v414_v42, %v390_v27  ;;  %v432_v47 = vsel %vm419_vm0, %v412_v43, %v388_v23  ;;  %v420_v48 = vsel %vm419_vm0, %v404_v35, %v412_v43  ;;  %v421_v49 = vsel %vm419_vm0, %v406_v34, %v414_v42 }
  0x82   :  { %257 = vrot.lane.b32.xlu1 %v1915_v3, %s1845_s20  ;;  %255 = vrot.lane.b32.xlu0 %v1903_v1, %s1845_s20  ;;  %v459_v50 = vmul.f32 %v442_v40, %v432_v47  ;;  %v463_v51 = vmul.f32 %v442_v40, %v433_v46  ;;  %v462_v52 = vmul.f32 %v454_v41, %v420_v48  ;;  %v1710_v47 = vld [vmem:[%s2689_s7 + $0x5] ss:$8 sm:$0xf] }
  0x83   :  { %v466_v53 = vmul.f32 %v454_v41, %v421_v49  ;;  %v493_v46 = vpack.c.bf16 %v1910_v2, %v1898_v0  ;;  %v492_v48 = vpack.c.bf16 %v1915_v3, %v1903_v1  ;;  %v497_v49 = vpack.c.bf16 %v1958_v10, %v1963_v11 }
  0x84   :  { %v394_v54 = vpop.permute.xlu1 %393  ;;  %v392_v55 = vpop.permute.xlu0 %391  ;;  %v475_v56 = vpack.c.bf16 %v463_v51, %v459_v50  ;;  %v2146_v50 = vrot.slane %v1710_v47, %v2070_v32 }
  0x85   :  { %v478_v57 = vpack.c.bf16 %v466_v53, %v462_v52  ;;  %v494_v53 = vpack.c.bf16 %v1922_v4, %v1927_v5 }
  0x86   :  { %265 = vrot.lane.b32.xlu1 %v1910_v2, %s1845_s20  ;;  %263 = vrot.lane.b32.xlu0 %v1898_v0, %s1845_s20 }
  0x87   :  { %659 = vmatpush1.bf16.msra.mxu0 %v475_v56  ;;  %711 = vmatprep.subr.bf16.mxu1 %v478_v57  ;;  %v499_v56 = vpack.c.bf16 %v1982_v14, %v1987_v15  ;;  %v567_v57 = vrot.slane %v1710_v47, %v2049_v20 }
  0x88   :  { %712 = vmatpush1.bf16.msra.mxu1 %v477_v58  ;;  %v402_v59 = vpop.permute.xlu1 %401  ;;  %v400_v60 = vpop.permute.xlu0 %399  ;;  %v496_v58 = vpack.c.bf16 %v1946_v8, %v1951_v9 }
  0x89   :  { %v431_v61 = vsel %vm419_vm0, %v394_v54, %v402_v59  ;;  %v430_v62 = vsel %vm419_vm0, %v392_v55, %v400_v60 }
  0x8a   :  { %v472_v63 = vmul.f32 %v446_v24, %v431_v61  ;;  %v468_v17 = vmul.f32 %v446_v24, %v430_v62  ;;  %273 = vrot.lane.b32.xlu1 %v1922_v4, %s1845_s20  ;;  %271 = vrot.lane.b32.xlu0 %v1927_v5, %s1845_s20 }
  0x8c   :  { %v410_v18 = vpop.permute.xlu1 %409  ;;  %v408_v21 = vpop.permute.xlu0 %407  ;;  %v480_v22 = vpack.c.bf16 %v472_v63, %v468_v17  ;;  %v498_v63 = vpack.c.bf16 %v1970_v12, %v1975_v13 }
  0x8d   :  { %v427_v23 = vsel %vm419_vm0, %v402_v59, %v410_v18  ;;  %v426_v25 = vsel %vm419_vm0, %v400_v60, %v408_v21 }
  0x8e   :  { %281 = vrot.lane.b32.xlu1 %v1934_v6, %s1845_s20  ;;  %279 = vrot.lane.b32.xlu0 %v1939_v7, %s1845_s20  ;;  %v473_v24 = vmul.f32 %v450_v37, %v427_v23  ;;  %v469_v26 = vmul.f32 %v450_v37, %v426_v25  ;;  %v575_v25 = vrot.slane %v1710_v47, %v2072_v33 }
  0x8f   :  { %660 = vmatprep.subr.bf16.mxu0 %v480_v22 }
  0x90   :  { %v418_v27 = vpop.permute.xlu1 %417  ;;  %v416_v29 = vpop.permute.xlu0 %415 }
  0x91   :  { %v423_v30 = vsel %vm419_vm0, %v410_v18, %v418_v27  ;;  %v435_v31 = vsel %vm419_vm0, %v418_v27, %v394_v54  ;;  %v422_v34 = vsel %vm419_vm0, %v408_v21, %v416_v29  ;;  %v434_v35 = vsel %vm419_vm0, %v416_v29, %v392_v55 }
  0x92   :  { %v471_v36 = vmul.f32 %v442_v40, %v435_v31  ;;  %v474_v38 = vmul.f32 %v454_v41, %v423_v30  ;;  %v467_v39 = vmul.f32 %v442_v40, %v434_v35  ;;  %v470_v42 = vmul.f32 %v454_v41, %v422_v34  ;;  %261 = vrot.lane.b32.xlu1 %v1946_v8, %s1845_s20 }
  0x93   :  { %259 = vrot.lane.b32.xlu0 %v1951_v9, %s1845_s20  ;;  %v495_v40 = vpack.c.bf16 %v1934_v6, %v1939_v7  ;;  %v481_v41 = vpack.c.bf16 %v473_v24, %v469_v26  ;;  %v571_v21 = vrot.slane %v1710_v47, %v2062_v28 }
  0x94   :  { %v511_v37 = vpop.permute.xlu1 %510  ;;  %v509_v43 = vpop.permute.xlu0 %508  ;;  %v479_v44 = vpack.c.bf16 %v471_v36, %v467_v39  ;;  %v482_v45 = vpack.c.bf16 %v474_v38, %v470_v42 }
  0x96   :  { %269 = vrot.lane.b32.xlu1 %v1958_v10, %s1845_s20  ;;  %661 = vmatpush1.bf16.msra.mxu0 %v479_v44 }
  0x97   :  { %267 = vrot.lane.b32.xlu0 %v1963_v11, %s1845_s20  ;;  %713 = vmatprep.subr.bf16.mxu1 %v482_v45 }
  0x98   :  { %714 = vmatpush1.bf16.msra.mxu1 %v481_v41  ;;  %v519_v51 = vpop.permute.xlu1 %518  ;;  %v517_v52 = vpop.permute.xlu0 %516  ;;  %662 = vmatprep.subr.bf16.mxu0 %v493_v46 }
  0x99   :  { %v550_v54 = vsel %vm540_vm1, %v511_v37, %v519_v51  ;;  %v549_v55 = vsel %vm540_vm1, %v509_v43, %v517_v52  ;;  %715 = vmatprep.subr.bf16.mxu1 %v495_v40 }
  0x9a   :  { %277 = vrot.lane.b32.xlu1 %v1970_v12, %s1845_s20  ;;  %663 = vmatpush1.bf16.msra.mxu0 %v492_v48  ;;  %v584_v59 = vmul.f32 %v2146_v50, %v550_v54  ;;  %v580_v60 = vmul.f32 %v2146_v50, %v549_v55 }
  0x9b   :  { %275 = vrot.lane.b32.xlu0 %v1975_v13, %s1845_s20  ;;  %664 = vmatprep.subr.bf16.mxu0 %v497_v49 }
  0x9c   :  { %v527_v61 = vpop.permute.xlu1 %526  ;;  %v525_v62 = vpop.permute.xlu0 %524  ;;  %716 = vmatpush1.bf16.msra.mxu1 %v494_v53  ;;  %v596_v29 = vpack.c.bf16 %v584_v59, %v580_v60 }
  0x9d   :  { %v546_v17 = vsel %vm540_vm1, %v519_v51, %v527_v61  ;;  %v545_v18 = vsel %vm540_vm1, %v517_v52, %v525_v62  ;;  %717 = vmatprep.subr.bf16.mxu1 %v499_v56 }
  0x9e   :  { %v585_v22 = vmul.f32 %v567_v57, %v546_v17  ;;  %v581_v23 = vmul.f32 %v567_v57, %v545_v18  ;;  %285 = vrot.lane.b32.xlu1 %v1982_v14, %s1845_s20  ;;  %665 = vmatpush1.bf16.msra.mxu0 %v496_v58 }
  0x9f   :  { %283 = vrot.lane.b32.xlu0 %v1987_v15, %s1845_s20 }
  0xa0   :  { %v535_v24 = vpop.permute.xlu1 %534  ;;  %v533_v26 = vpop.permute.xlu0 %532  ;;  %v597_v27 = vpack.c.bf16 %v585_v22, %v581_v23  ;;  %718 = vmatpush1.bf16.msra.mxu1 %v498_v63 }
  0xa1   :  { %v542_v30 = vsel %vm540_vm1, %v527_v61, %v535_v24  ;;  %v554_v31 = vsel %vm540_vm1, %v535_v24, %v511_v37  ;;  %v541_v34 = vsel %vm540_vm1, %v525_v62, %v533_v26  ;;  %v553_v35 = vsel %vm540_vm1, %v533_v26, %v509_v43  ;;  %v97_v24 = vld [vmem:[%s2689_s7] ss:$8 sm:$0xf] }
  0xa2   :  { %v586_v36 = vmul.f32 %v571_v21, %v542_v30  ;;  %v587_v38 = vmul.f32 %v575_v25, %v554_v31  ;;  %v582_v39 = vmul.f32 %v571_v21, %v541_v34  ;;  %v583_v42 = vmul.f32 %v575_v25, %v553_v35  ;;  %888 = vrot.lane.b32.xlu1 %v1915_v3, %s1846_s23 }
  0xa3   :  { %886 = vrot.lane.b32.xlu0 %v1903_v1, %s1846_s23  ;;  %666 = vmatprep.subr.bf16.mxu0 %v597_v27 }
  0xa4   :  { %667 = vmatpush1.bf16.msra.mxu0 %v596_v29  ;;  %v515_v37 = vpop.permute.xlu1 %514  ;;  %v513_v44 = vpop.permute.xlu0 %512  ;;  %v599_v45 = vpack.c.bf16 %v587_v38, %v583_v42  ;;  %v598_v46 = vpack.c.bf16 %v586_v36, %v582_v39  ;;  %v110_v42 = vrot.slane %v97_v24, %v2062_v28 }
  0xa6   :  { %896 = vrot.lane.b32.xlu1 %v1910_v2, %s1846_s23  ;;  %719 = vmatprep.subr.bf16.mxu1 %v599_v45 }
  0xa7   :  { %894 = vrot.lane.b32.xlu0 %v1898_v0, %s1846_s23  ;;  %720 = vmatpush1.bf16.msra.mxu1 %v598_v46  ;;  %v1811_v46 = vld [vmem:[%s2688_s1 + $0x18] sm:$0xff]  }
  0xa8   :  { %v523_v43 = vpop.permute.xlu1 %522  ;;  %v521_v47 = vpop.permute.xlu0 %520 }
  0xa9   :  { %v552_v40 = vsel %vm540_vm1, %v515_v37, %v523_v43  ;;  %v551_v41 = vsel %vm540_vm1, %v513_v44, %v521_v47 }
  0xaa   :  { %904 = vrot.lane.b32.xlu1 %v1922_v4, %s1846_s23  ;;  %v592_v48 = vmul.f32 %v2146_v50, %v552_v40  ;;  %v588_v49 = vmul.f32 %v2146_v50, %v551_v41  ;;  %v102_v40 = vrot.slane %v97_v24, %v2070_v32  ;;  %v114_v41 = vrot.slane %v97_v24, %v2072_v33 }
  0xab   :  { %902 = vrot.lane.b32.xlu0 %v1927_v5, %s1846_s23 }
  0xac   :  { %v531_v51 = vpop.permute.xlu1 %530  ;;  %v529_v52 = vpop.permute.xlu0 %528  ;;  %v600_v50 = vpack.c.bf16 %v592_v48, %v588_v49 }
  0xad   :  { %v548_v53 = vsel %vm540_vm1, %v523_v43, %v531_v51  ;;  %v547_v54 = vsel %vm540_vm1, %v521_v47, %v529_v52 }
  0xae   :  { %v593_v55 = vmul.f32 %v567_v57, %v548_v53  ;;  %v589_v56 = vmul.f32 %v567_v57, %v547_v54  ;;  %912 = vrot.lane.b32.xlu1 %v1934_v6, %s1846_s23 }
  0xaf   :  { %910 = vrot.lane.b32.xlu0 %v1939_v7, %s1846_s23 }
  0xb0   :  { %v539_v58 = vpop.permute.xlu1 %538  ;;  %v537_v59 = vpop.permute.xlu0 %536  ;;  %v601_v60 = vpack.c.bf16 %v593_v55, %v589_v56 }
  0xb1   :  { %v544_v61 = vsel %vm540_vm1, %v531_v51, %v539_v58  ;;  %v556_v62 = vsel %vm540_vm1, %v539_v58, %v515_v37  ;;  %v543_v63 = vsel %vm540_vm1, %v529_v52, %v537_v59  ;;  %v555_v57 = vsel %vm540_vm1, %v537_v59, %v513_v44 }
  0xb2   :  { %v594_v17 = vmul.f32 %v571_v21, %v544_v61  ;;  %v595_v18 = vmul.f32 %v575_v25, %v556_v62  ;;  %v590_v22 = vmul.f32 %v571_v21, %v543_v63  ;;  %v591_v23 = vmul.f32 %v575_v25, %v555_v57  ;;  %892 = vrot.lane.b32.xlu1 %v1946_v8, %s1846_s23  ;;  %v1810_v21 = vld [vmem:[%s2688_s1 + $0x10] sm:$0xff]  }
  0xb3   :  { %890 = vrot.lane.b32.xlu0 %v1951_v9, %s1846_s23  ;;  %668 = vmatprep.subr.bf16.mxu0 %v601_v60  ;;  %v106_v25 = vrot.slane %v97_v24, %v2049_v20 }
  0xb4   :  { %669 = vmatpush1.bf16.msra.mxu0 %v600_v50  ;;  %v49_v26 = vpop.permute.xlu1 %48  ;;  %v47_v27 = vpop.permute.xlu0 %46  ;;  %v603_v29 = vpack.c.bf16 %v595_v18, %v591_v23  ;;  %v602_v30 = vpack.c.bf16 %v594_v17, %v590_v22 }
  0xb6   :  { %900 = vrot.lane.b32.xlu1 %v1958_v10, %s1846_s23  ;;  %721 = vmatprep.subr.bf16.mxu1 %v603_v29 }
  0xb7   :  { %898 = vrot.lane.b32.xlu0 %v1963_v11, %s1846_s23  ;;  %722 = vmatpush1.bf16.msra.mxu1 %v602_v30 }
  0xb8   :  { %v57_v31 = vpop.permute.xlu1 %56  ;;  %v55_v34 = vpop.permute.xlu0 %54  ;;  %1717 = vmatmul.mubr.msk.bf16.vlgmr.msra.gmra.mrb[0].mxu0 %vm651_vm2, %v1810_v21 }
  0xb9   :  { %v90_v35 = vsel %vm80_vm3, %v49_v26, %v57_v31  ;;  %v89_v36 = vsel %vm80_vm3, %v47_v27, %v55_v34  ;;  %700 = vmatprep.mubr.bf16.mxu0 %v1843_v16 }
  0xba   :  { %v124_v38 = vmul.f32 %v106_v25, %v90_v35  ;;  %v120_v39 = vmul.f32 %v106_v25, %v89_v36  ;;  %908 = vrot.lane.b32.xlu1 %v1970_v12, %s1846_s23  ;;  %1719 = vmatmul.mubr.msk.bf16.vlgmr.msra.gmra.mrb[0].mxu1 %vm651_vm2, %v1810_v21 }
  0xbb   :  { %906 = vrot.lane.b32.xlu0 %v1975_v13, %s1846_s23  ;;  %753 = vmatprep.mubr.bf16.mxu1 %v1843_v16 }
  0xbc   :  { %v65_v37 = vpop.permute.xlu1 %64  ;;  %v63_v44 = vpop.permute.xlu0 %62  ;;  %v136_v45 = vpack.c.bf16 %v124_v38, %v120_v39 }
  0xbd   :  { %v86_v43 = vsel %vm80_vm3, %v57_v31, %v65_v37  ;;  %v85_v47 = vsel %vm80_vm3, %v55_v34, %v63_v44 }
  0xbe   :  { %916 = vrot.lane.b32.xlu1 %v1982_v14, %s1846_s23  ;;  %780 = vmatprep.subr.bf16.mxu0 %v136_v45  ;;  %v125_v48 = vmul.f32 %v110_v42, %v86_v43  ;;  %v121_v49 = vmul.f32 %v110_v42, %v85_v47 }
  0xbf   :  { %914 = vrot.lane.b32.xlu0 %v1987_v15, %s1846_s23 }
  0xc0   :  { %v73_v51 = vpop.permute.xlu1 %72  ;;  %v71_v52 = vpop.permute.xlu0 %70  ;;  %1718 = vmatmul.mubr.msk.bf16.gmra.mrb[4].mxu0 %vm651_vm2, %v1811_v46  ;;  %v137_v17 = vpack.c.bf16 %v125_v48, %v121_v49 }
  0xc1   :  { %v82_v53 = vsel %vm80_vm3, %v65_v37, %v73_v51  ;;  %v94_v54 = vsel %vm80_vm3, %v73_v51, %v49_v26  ;;  %v81_v55 = vsel %vm80_vm3, %v63_v44, %v71_v52  ;;  %v93_v56 = vsel %vm80_vm3, %v71_v52, %v47_v27  ;;  %812 = vmatprep.mubr.bf16.mxu0 %v1843_v16 }
  0xc2   :  { %v123_v58 = vmul.f32 %v102_v40, %v94_v54  ;;  %v126_v59 = vmul.f32 %v114_v41, %v82_v53  ;;  %v119_v60 = vmul.f32 %v102_v40, %v93_v56  ;;  %v122_v50 = vmul.f32 %v114_v41, %v81_v55  ;;  %993 = vrot.lane.b32.xlu1 %v1915_v3, %s1847_s30 }
  0xc3   :  { %991 = vrot.lane.b32.xlu0 %v1903_v1, %s1847_s30  ;;  %1720 = vmatmul.mubr.msk.bf16.gmra.mrb[4].mxu1 %vm651_vm2, %v1811_v46 }
  0xc4   :  { %v135_v61 = vpack.c.bf16 %v123_v58, %v119_v60  ;;  %v53_v62 = vpop.permute.xlu1 %52  ;;  %v51_v63 = vpop.permute.xlu0 %50  ;;  %v138_v57 = vpack.c.bf16 %v126_v59, %v122_v50  ;;  %865 = vmatprep.mubr.bf16.mxu1 %v1843_v16 }
  0xc6   :  { %1001 = vrot.lane.b32.xlu1 %v1910_v2, %s1847_s30  ;;  %781 = vmatpush1.bf16.msra.mxu0 %v135_v61 }
  0xc7   :  { %999 = vrot.lane.b32.xlu0 %v1898_v0, %s1847_s30  ;;  %833 = vmatprep.subr.bf16.mxu1 %v138_v57 }
  0xc8   :  { %834 = vmatpush1.bf16.msra.mxu1 %v137_v17  ;;  %v61_v18 = vpop.permute.xlu1 %60  ;;  %v59_v22 = vpop.permute.xlu0 %58 }
  0xc9   :  { %v92_v23 = vsel %vm80_vm3, %v53_v62, %v61_v18  ;;  %v91_v24 = vsel %vm80_vm3, %v51_v63, %v59_v22 }
  0xca   :  { %v132_v26 = vmul.f32 %v106_v25, %v92_v23  ;;  %v128_v27 = vmul.f32 %v106_v25, %v91_v24  ;;  %1009 = vrot.lane.b32.xlu1 %v1922_v4, %s1847_s30 }
  0xcb   :  { %1007 = vrot.lane.b32.xlu0 %v1927_v5, %s1847_s30 }
  0xcc   :  { %v69_v29 = vpop.permute.xlu1 %68  ;;  %v67_v30 = vpop.permute.xlu0 %66  ;;  %v140_v21 = vpack.c.bf16 %v132_v26, %v128_v27 }
  0xcd   :  { %v88_v31 = vsel %vm80_vm3, %v61_v18, %v69_v29  ;;  %v87_v34 = vsel %vm80_vm3, %v59_v22, %v67_v30 }
  0xce   :  { %1017 = vrot.lane.b32.xlu1 %v1934_v6, %s1847_s30  ;;  %782 = vmatprep.subr.bf16.mxu0 %v140_v21  ;;  %v133_v25 = vmul.f32 %v110_v42, %v88_v31  ;;  %v129_v35 = vmul.f32 %v110_v42, %v87_v34  ;;  %v1707_v42 = vld [vmem:[%s2689_s7 + $0x1] ss:$8 sm:$0xf] }
  0xcf   :  { %1015 = vrot.lane.b32.xlu0 %v1939_v7, %s1847_s30  ;;  %v214_v50 = vrot.slane %v1707_v42, %v2062_v28  ;;  %v206_v18 = vrot.slane %v1707_v42, %v2070_v32  ;;  %v218_v22 = vrot.slane %v1707_v42, %v2072_v33 }
  0xd0   :  { %v77_v36 = vpop.permute.xlu1 %76  ;;  %v75_v38 = vpop.permute.xlu0 %74  ;;  %v141_v54 = vpack.c.bf16 %v133_v25, %v129_v35 }
  0xd1   :  { %v84_v39 = vsel %vm80_vm3, %v69_v29, %v77_v36  ;;  %v96_v37 = vsel %vm80_vm3, %v77_v36, %v53_v62  ;;  %v83_v44 = vsel %vm80_vm3, %v67_v30, %v75_v38  ;;  %v95_v45 = vsel %vm80_vm3, %v75_v38, %v51_v63 }
  0xd2   :  { %v131_v46 = vmul.f32 %v102_v40, %v96_v37  ;;  %v134_v43 = vmul.f32 %v114_v41, %v84_v39  ;;  %v127_v47 = vmul.f32 %v102_v40, %v95_v45  ;;  %v130_v48 = vmul.f32 %v114_v41, %v83_v44  ;;  %997 = vrot.lane.b32.xlu1 %v1946_v8, %s1847_s30 }
  0xd3   :  { %995 = vrot.lane.b32.xlu0 %v1951_v9, %s1847_s30  ;;  %v210_v40 = vrot.slane %v1707_v42, %v2049_v20 }
  0xd4   :  { %v139_v49 = vpack.c.bf16 %v131_v46, %v127_v47  ;;  %v154_v51 = vpop.permute.xlu1 %153  ;;  %v152_v52 = vpop.permute.xlu0 %151  ;;  %v142_v53 = vpack.c.bf16 %v134_v43, %v130_v48 }
  0xd6   :  { %1005 = vrot.lane.b32.xlu1 %v1958_v10, %s1847_s30  ;;  %783 = vmatpush1.bf16.msra.mxu0 %v139_v49 }
  0xd7   :  { %1003 = vrot.lane.b32.xlu0 %v1963_v11, %s1847_s30  ;;  %835 = vmatprep.subr.bf16.mxu1 %v142_v53 }
  0xd8   :  { %836 = vmatpush1.bf16.msra.mxu1 %v141_v54  ;;  %v162_v41 = vpop.permute.xlu1 %161  ;;  %v160_v55 = vpop.permute.xlu0 %159 }
  0xd9   :  { %v193_v56 = vsel %vm183_vm4, %v154_v51, %v162_v41  ;;  %v192_v58 = vsel %vm183_vm4, %v152_v52, %v160_v55 }
  0xda   :  { %v228_v59 = vmul.f32 %v210_v40, %v193_v56  ;;  %v224_v60 = vmul.f32 %v210_v40, %v192_v58  ;;  %1013 = vrot.lane.b32.xlu1 %v1970_v12, %s1847_s30 }
  0xdb   :  { %1011 = vrot.lane.b32.xlu0 %v1975_v13, %s1847_s30 }
  0xdc   :  { %v170_v61 = vpop.permute.xlu1 %169  ;;  %v168_v62 = vpop.permute.xlu0 %167  ;;  %v240_v63 = vpack.c.bf16 %v228_v59, %v224_v60  ;;  %v1708_v59 = vld [vmem:[%s2689_s7 + $0x2] ss:$8 sm:$0xf] }
  0xdd   :  { %v189_v57 = vsel %vm183_vm4, %v162_v41, %v170_v61  ;;  %v188_v17 = vsel %vm183_vm4, %v160_v55, %v168_v62 }
  0xde   :  { %1021 = vrot.lane.b32.xlu1 %v1982_v14, %s1847_s30  ;;  %784 = vmatprep.subr.bf16.mxu0 %v240_v63  ;;  %v229_v23 = vmul.f32 %v214_v50, %v189_v57  ;;  %v225_v24 = vmul.f32 %v214_v50, %v188_v17 }
  0xdf   :  { %1019 = vrot.lane.b32.xlu0 %v1987_v15, %s1847_s30 }
  0xe0   :  { %v178_v26 = vpop.permute.xlu1 %177  ;;  %v176_v27 = vpop.permute.xlu0 %175  ;;  %v241_v45 = vpack.c.bf16 %v229_v23, %v225_v24 }
  0xe1   :  { %v185_v29 = vsel %vm183_vm4, %v170_v61, %v178_v26  ;;  %v197_v30 = vsel %vm183_vm4, %v178_v26, %v154_v51  ;;  %v184_v21 = vsel %vm183_vm4, %v168_v62, %v176_v27  ;;  %v196_v31 = vsel %vm183_vm4, %v176_v27, %v152_v52 }
  0xe2   :  { %v227_v34 = vmul.f32 %v206_v18, %v197_v30  ;;  %v230_v25 = vmul.f32 %v218_v22, %v185_v29  ;;  %v223_v35 = vmul.f32 %v206_v18, %v196_v31  ;;  %v226_v36 = vmul.f32 %v218_v22, %v184_v21  ;;  %1097 = vrot.lane.b32.xlu1 %v1915_v3, %s1848_s12 }
  0xe3   :  { %1095 = vrot.lane.b32.xlu0 %v1903_v1, %s1848_s12  ;;  %v322_v30 = vrot.slane %v1708_v59, %v2072_v33 }
  0xe4   :  { %v239_v38 = vpack.c.bf16 %v227_v34, %v223_v35  ;;  %v158_v39 = vpop.permute.xlu1 %157  ;;  %v156_v37 = vpop.permute.xlu0 %155  ;;  %v242_v44 = vpack.c.bf16 %v230_v25, %v226_v36 }
  0xe6   :  { %1105 = vrot.lane.b32.xlu1 %v1910_v2, %s1848_s12  ;;  %785 = vmatpush1.bf16.msra.mxu0 %v239_v38 }
  0xe7   :  { %1103 = vrot.lane.b32.xlu0 %v1898_v0, %s1848_s12  ;;  %837 = vmatprep.subr.bf16.mxu1 %v242_v44 }
  0xe8   :  { %838 = vmatpush1.bf16.msra.mxu1 %v241_v45  ;;  %v166_v46 = vpop.permute.xlu1 %165  ;;  %v164_v43 = vpop.permute.xlu0 %163 }
  0xe9   :  { %v195_v3 = vsel %vm183_vm4, %v158_v39, %v166_v46  ;;  %v194_v1 = vsel %vm183_vm4, %v156_v37, %v164_v43 }
  0xea   :  { %v236_v47 = vmul.f32 %v210_v40, %v195_v3  ;;  %v232_v48 = vmul.f32 %v210_v40, %v194_v1  ;;  %1113 = vrot.lane.b32.xlu1 %v1922_v4, %s1848_s12  ;;  %v1366_v3 = vld [vmem:[%s2690_s2] sm:$0xff] }
  0xeb   :  { %1111 = vrot.lane.b32.xlu0 %v1927_v5, %s1848_s12 }
  0xec   :  { %v174_v2 = vpop.permute.xlu1 %173  ;;  %v172_v0 = vpop.permute.xlu0 %171  ;;  %v244_v42 = vpack.c.bf16 %v236_v47, %v232_v48  ;;  %v1368_v48 = vld [vmem:[%s2690_s2 + $0x10] sm:$0xff] }
  0xed   :  { %v191_v49 = vsel %vm183_vm4, %v166_v46, %v174_v2  ;;  %v190_v51 = vsel %vm183_vm4, %v164_v43, %v172_v0  ;;  %v1367_v43 = vld [vmem:[%s2690_s2 + $0x8] sm:$0xff] }
  0xee   :  { %1121 = vrot.lane.b32.xlu1 %v1934_v6, %s1848_s12  ;;  %786 = vmatprep.subr.bf16.mxu0 %v244_v42  ;;  %v237_v4 = vmul.f32 %v214_v50, %v191_v49  ;;  %v233_v52 = vmul.f32 %v214_v50, %v190_v51 }
  0xef   :  { %1119 = vrot.lane.b32.xlu0 %v1939_v7, %s1848_s12 }
  0xf0   :  { %v182_v53 = vpop.permute.xlu1 %181  ;;  %v180_v5 = vpop.permute.xlu0 %179  ;;  %v245_v63 = vpack.c.bf16 %v237_v4, %v233_v52  ;;  %v1443_v52 = vld [vmem:[%s2691_s4 + $0x10] sm:$0xff] }
  0xf1   :  { %v187_v54 = vsel %vm183_vm4, %v174_v2, %v182_v53  ;;  %v199_v40 = vsel %vm183_vm4, %v182_v53, %v158_v39  ;;  %v186_v41 = vsel %vm183_vm4, %v172_v0, %v180_v5  ;;  %v198_v6 = vsel %vm183_vm4, %v180_v5, %v156_v37  ;;  %v1369_v2 = vld [vmem:[%s2690_s2 + $0x18] sm:$0xff]  ;;  %v1442_v53 = vld [vmem:[%s2691_s4 + $0x8] sm:$0xff] }
  0xf2   :  { %v235_v55 = vmul.f32 %v206_v18, %v199_v40  ;;  %v238_v56 = vmul.f32 %v218_v22, %v187_v54  ;;  %v231_v58 = vmul.f32 %v206_v18, %v198_v6  ;;  %v234_v7 = vmul.f32 %v218_v22, %v186_v41  ;;  %1101 = vrot.lane.b32.xlu1 %v1946_v8, %s1848_s12 }
  0xf3   :  { %1099 = vrot.lane.b32.xlu0 %v1951_v9, %s1848_s12  ;;  %v314_v8 = vrot.slane %v1708_v59, %v2049_v20 }
  0xf4   :  { %v243_v60 = vpack.c.bf16 %v235_v55, %v231_v58  ;;  %v258_v50 = vpop.permute.xlu1 %257  ;;  %v256_v61 = vpop.permute.xlu0 %255  ;;  %v246_v62 = vpack.c.bf16 %v238_v56, %v234_v7  ;;  %v1441_v56 = vld [vmem:[%s2691_s4] sm:$0xff] }
  0xf6   :  { %1109 = vrot.lane.b32.xlu1 %v1958_v10, %s1848_s12  ;;  %787 = vmatpush1.bf16.msra.mxu0 %v243_v60 }
  0xf7   :  { %1107 = vrot.lane.b32.xlu0 %v1963_v11, %s1848_s12  ;;  %839 = vmatprep.subr.bf16.mxu1 %v246_v62  ;;  %v318_v11 = vrot.slane %v1708_v59, %v2062_v28 }
  0xf8   :  { %840 = vmatpush1.bf16.msra.mxu1 %v245_v63  ;;  %v266_v9 = vpop.permute.xlu1 %265  ;;  %v264_v57 = vpop.permute.xlu0 %263 }
  0xf9   :  { %v297_v17 = vsel %vm287_vm5, %v258_v50, %v266_v9  ;;  %v296_v18 = vsel %vm287_vm5, %v256_v61, %v264_v57 }
  0xfa   :  { %v332_v22 = vmul.f32 %v314_v8, %v297_v17  ;;  %v328_v10 = vmul.f32 %v314_v8, %v296_v18  ;;  %1117 = vrot.lane.b32.xlu1 %v1970_v12, %s1848_s12  ;;  %v310_v12 = vrot.slane %v1708_v59, %v2070_v32 }
  0xfb   :  { %1115 = vrot.lane.b32.xlu0 %v1975_v13, %s1848_s12 }
  0xfc   :  { %v274_v23 = vpop.permute.xlu1 %273  ;;  %v272_v24 = vpop.permute.xlu0 %271  ;;  %v344_v26 = vpack.c.bf16 %v332_v22, %v328_v10 }
  0xfd   :  { %v293_v27 = vsel %vm287_vm5, %v266_v9, %v274_v23  ;;  %v292_v29 = vsel %vm287_vm5, %v264_v57, %v272_v24 }
  0xfe   :  { %1125 = vrot.lane.b32.xlu1 %v1982_v14, %s1848_s12  ;;  %788 = vmatprep.subr.bf16.mxu0 %v344_v26  ;;  %v333_v13 = vmul.f32 %v318_v11, %v293_v27  ;;  %v329_v21 = vmul.f32 %v318_v11, %v292_v29  ;;  %v1812_v26 = vld [vmem:[%s2688_s1] sm:$0xff]  }
  0xff   :  { %1123 = vrot.lane.b32.xlu0 %v1987_v15, %s1848_s12 }
 0x100   :  { %v282_v31 = vpop.permute.xlu1 %281  ;;  %v280_v34 = vpop.permute.xlu0 %279  ;;  %v345_v1 = vpack.c.bf16 %v333_v13, %v329_v21 }
 0x101   :  { %v289_v25 = vsel %vm287_vm5, %v274_v23, %v282_v31  ;;  %v301_v35 = vsel %vm287_vm5, %v282_v31, %v258_v50  ;;  %v288_v14 = vsel %vm287_vm5, %v272_v24, %v280_v34  ;;  %v300_v36 = vsel %vm287_vm5, %v280_v34, %v256_v61  ;;  %v1727_v24 = vld [vmem:[%s2689_s7 + $0x6] ss:$8 sm:$0xf] }
 0x102   :  { %v331_v38 = vmul.f32 %v310_v12, %v301_v35  ;;  %v334_v39 = vmul.f32 %v322_v30, %v289_v25  ;;  %v327_v37 = vmul.f32 %v310_v12, %v300_v36  ;;  %v330_v15 = vmul.f32 %v322_v30, %v288_v14  ;;  %1377 = vperm.xlu1 %1809, %v1367_v43  }
 0x103   :  { %1372 = vperm.xlu0 %1808, %v1366_v3   ;;  %v941_v29 = vrot.slane %v1727_v24, %v2070_v32  ;;  %v945_v21 = vrot.slane %v1727_v24, %v2049_v20 }
 0x104   :  { %v343_v44 = vpack.c.bf16 %v331_v38, %v327_v37  ;;  %v262_v45 = vpop.permute.xlu1 %261  ;;  %v346_v46 = vpack.c.bf16 %v334_v39, %v330_v15  ;;  %v949_v39 = vrot.slane %v1727_v24, %v2062_v28  ;;  %v953_v37 = vrot.slane %v1727_v24, %v2072_v33  ;;  %v1813_v15 = vld [vmem:[%s2688_s1 + $0x8] sm:$0xff]  }
 0x105   :  { %v260_v47 = vpop.permute.xlu0 %259 }
 0x106   :  { %789 = vmatpush1.bf16.msra.mxu0 %v343_v44  ;;  %841 = vmatprep.subr.bf16.mxu1 %v346_v46 }
 0x107   :  { %842 = vmatpush1.bf16.msra.mxu1 %v345_v1  ;;  %1382 = vperm.xlu1 %1809, %v1368_v48  }
 0x108   :  { %v270_v0 = vpop.permute.xlu1 %269  ;;  %1387 = vperm.xlu0 %1808, %v1369_v2  }
 0x109   :  { %v299_v42 = vsel %vm287_vm5, %v262_v45, %v270_v0  ;;  %v268_v49 = vpop.permute.xlu0 %267 }
 0x10a   :  { %v340_v51 = vmul.f32 %v314_v8, %v299_v42  ;;  %v298_v4 = vsel %vm287_vm5, %v260_v47, %v268_v49 }
 0x10b   :  { %v336_v5 = vmul.f32 %v314_v8, %v298_v4  ;;  %1456 = vperm.xlu1 %1809, %v1443_v52  }
 0x10c   :  { %v278_v54 = vpop.permute.xlu1 %277  ;;  %1451 = vperm.xlu0 %1808, %v1442_v53  }
 0x10d   :  { %v276_v40 = vpop.permute.xlu0 %275  ;;  %v348_v41 = vpack.c.bf16 %v340_v51, %v336_v5  ;;  %v295_v6 = vsel %vm287_vm5, %v270_v0, %v278_v54 }
 0x10e   :  { %v294_v55 = vsel %vm287_vm5, %v268_v49, %v276_v40  ;;  %v341_v7 = vmul.f32 %v318_v11, %v295_v6 }
 0x10f   :  { %790 = vmatprep.subr.bf16.mxu0 %v348_v41  ;;  %v337_v59 = vmul.f32 %v318_v11, %v294_v55  ;;  %1446 = vperm.xlu1 %1809, %v1441_v56  }
 0x110   :  { %v286_v58 = vpop.permute.xlu1 %285 }
 0x111   :  { %v291_v60 = vsel %vm287_vm5, %v278_v54, %v286_v58  ;;  %v303_v50 = vsel %vm287_vm5, %v286_v58, %v262_v45  ;;  %v284_v61 = vpop.permute.xlu0 %283  ;;  %v349_v23 = vpack.c.bf16 %v341_v7, %v337_v59 }
 0x112   :  { %v339_v62 = vmul.f32 %v310_v12, %v303_v50  ;;  %v342_v63 = vmul.f32 %v322_v30, %v291_v60  ;;  %v290_v8 = vsel %vm287_vm5, %v276_v40, %v284_v61  ;;  %v302_v9 = vsel %vm287_vm5, %v284_v61, %v260_v47 }
 0x113   :  { %v335_v57 = vmul.f32 %v310_v12, %v302_v9  ;;  %v338_v17 = vmul.f32 %v322_v30, %v290_v8 }
 0x114   :  { %v889_v18 = vpop.permute.xlu1 %888 }
 0x115   :  { %v347_v22 = vpack.c.bf16 %v339_v62, %v335_v57  ;;  %v887_v10 = vpop.permute.xlu0 %886  ;;  %v350_v11 = vpack.c.bf16 %v342_v63, %v338_v17 }
 0x117   :  { %791 = vmatpush1.bf16.msra.mxu0 %v347_v22  ;;  %843 = vmatprep.subr.bf16.mxu1 %v350_v11 }
 0x118   :  { %844 = vmatpush1.bf16.msra.mxu1 %v349_v23  ;;  %v897_v27 = vpop.permute.xlu1 %896 }
 0x119   :  { %v895_v12 = vpop.permute.xlu0 %894  ;;  %v928_v30 = vsel %vm918_vm6, %v889_v18, %v897_v27 }
 0x11a   :  { %v927_v13 = vsel %vm918_vm6, %v887_v10, %v895_v12  ;;  %1723 = vmatmul.mubr.msk.bf16.vlgmr.msra.gmra.mrb[0].mxu0 %vm651_vm2, %v1812_v26  ;;  %v962_v34 = vmul.f32 %v941_v29, %v928_v30  ;;  %v1728_v30 = vld [vmem:[%s2689_s7 + $0x7] ss:$8 sm:$0xf] }
 0x11b   :  { %1725 = vmatmul.mubr.msk.bf16.vlgmr.msra.gmra.mrb[0].mxu1 %vm651_vm2, %v1812_v26  ;;  %822 = vmatprep.mubr.bf16.mxu0 %v1843_v16  ;;  %v958_v25 = vmul.f32 %v941_v29, %v927_v13 }
 0x11c   :  { %v905_v31 = vpop.permute.xlu1 %904  ;;  %875 = vmatprep.mubr.bf16.mxu1 %v1843_v16 }
 0x11d   :  { %v924_v35 = vsel %vm918_vm6, %v897_v27, %v905_v31  ;;  %v903_v14 = vpop.permute.xlu0 %902  ;;  %v974_v46 = vpack.c.bf16 %v962_v34, %v958_v25 }
 0x11e   :  { %v963_v36 = vmul.f32 %v945_v21, %v924_v35  ;;  %v923_v38 = vsel %vm918_vm6, %v895_v12, %v903_v14  ;;  %v1050_v35 = vrot.slane %v1728_v30, %v2049_v20 }
 0x11f   :  { %v959_v44 = vmul.f32 %v945_v21, %v923_v38 }
 0x120   :  { %v913_v45 = vpop.permute.xlu1 %912 }
 0x121   :  { %v920_v43 = vsel %vm918_vm6, %v905_v31, %v913_v45  ;;  %v932_v3 = vsel %vm918_vm6, %v913_v45, %v889_v18  ;;  %v911_v1 = vpop.permute.xlu0 %910  ;;  %v975_v47 = vpack.c.bf16 %v963_v36, %v959_v44  ;;  %v1054_v45 = vrot.slane %v1728_v30, %v2062_v28 }
 0x122   :  { %v964_v48 = vmul.f32 %v949_v39, %v920_v43  ;;  %v965_v2 = vmul.f32 %v953_v37, %v932_v3  ;;  %v919_v0 = vsel %vm918_vm6, %v903_v14, %v911_v1  ;;  %v931_v42 = vsel %vm918_vm6, %v911_v1, %v887_v10  ;;  %1724 = vmatmul.mubr.msk.bf16.gmra.mrb[4].mxu0 %vm651_vm2, %v1813_v15 }
 0x123   :  { %v960_v49 = vmul.f32 %v949_v39, %v919_v0  ;;  %v961_v51 = vmul.f32 %v953_v37, %v931_v42  ;;  %1244 = vmatprep.subr.bf16.mxu0 %v975_v47  ;;  %1726 = vmatmul.mubr.msk.bf16.gmra.mrb[4].mxu1 %vm651_vm2, %v1813_v15 }
 0x124   :  { %1245 = vmatpush1.bf16.msra.mxu0 %v974_v46  ;;  %v893_v4 = vpop.permute.xlu1 %892  ;;  %1276 = vmatprep.mubr.bf16.mxu0 %v1843_v16  ;;  %v1058_v46 = vrot.slane %v1728_v30, %v2072_v33 }
 0x125   :  { %v976_v52 = vpack.c.bf16 %v964_v48, %v960_v49  ;;  %v891_v53 = vpop.permute.xlu0 %890  ;;  %v977_v5 = vpack.c.bf16 %v965_v2, %v961_v51  ;;  %1329 = vmatprep.mubr.bf16.mxu1 %v1843_v16 }
 0x127   :  { %1297 = vmatprep.subr.bf16.mxu1 %v977_v5 }
 0x128   :  { %1298 = vmatpush1.bf16.msra.mxu1 %v976_v52  ;;  %v901_v54 = vpop.permute.xlu1 %900 }
 0x129   :  { %v899_v40 = vpop.permute.xlu0 %898  ;;  %v930_v41 = vsel %vm918_vm6, %v893_v4, %v901_v54 }
 0x12a   :  { %v929_v6 = vsel %vm918_vm6, %v891_v53, %v899_v40  ;;  %v970_v56 = vmul.f32 %v941_v29, %v930_v41 }
 0x12b   :  { %v966_v58 = vmul.f32 %v941_v29, %v929_v6 }
 0x12c   :  { %v909_v55 = vpop.permute.xlu1 %908 }
 0x12d   :  { %v926_v7 = vsel %vm918_vm6, %v901_v54, %v909_v55  ;;  %v907_v59 = vpop.permute.xlu0 %906  ;;  %v978_v63 = vpack.c.bf16 %v970_v56, %v966_v58 }
 0x12e   :  { %v971_v60 = vmul.f32 %v945_v21, %v926_v7  ;;  %v925_v50 = vsel %vm918_vm6, %v899_v40, %v907_v59 }
 0x12f   :  { %v967_v61 = vmul.f32 %v945_v21, %v925_v50  ;;  %v1046_v21 = vrot.slane %v1728_v30, %v2070_v32 }
 0x130   :  { %v917_v62 = vpop.permute.xlu1 %916 }
 0x131   :  { %v922_v8 = vsel %vm918_vm6, %v909_v55, %v917_v62  ;;  %v934_v9 = vsel %vm918_vm6, %v917_v62, %v893_v4  ;;  %v915_v57 = vpop.permute.xlu0 %914  ;;  %v979_v17 = vpack.c.bf16 %v971_v60, %v967_v61 }
 0x132   :  { %v972_v18 = vmul.f32 %v949_v39, %v922_v8  ;;  %v973_v22 = vmul.f32 %v953_v37, %v934_v9  ;;  %v921_v10 = vsel %vm918_vm6, %v907_v59, %v915_v57  ;;  %v933_v11 = vsel %vm918_vm6, %v915_v57, %v891_v53 }
 0x133   :  { %v968_v23 = vmul.f32 %v949_v39, %v921_v10  ;;  %v969_v24 = vmul.f32 %v953_v37, %v933_v11  ;;  %1246 = vmatprep.subr.bf16.mxu0 %v979_v17 }
 0x134   :  { %1247 = vmatpush1.bf16.msra.mxu0 %v978_v63  ;;  %v994_v26 = vpop.permute.xlu1 %993 }
 0x135   :  { %v980_v27 = vpack.c.bf16 %v972_v18, %v968_v23  ;;  %v992_v29 = vpop.permute.xlu0 %991  ;;  %v981_v12 = vpack.c.bf16 %v973_v22, %v969_v24 }
 0x137   :  { %1299 = vmatprep.subr.bf16.mxu1 %v981_v12 }
 0x138   :  { %1300 = vmatpush1.bf16.msra.mxu1 %v980_v27  ;;  %v1002_v13 = vpop.permute.xlu1 %1001 }
 0x139   :  { %v1000_v31 = vpop.permute.xlu0 %999  ;;  %v1033_v34 = vsel %vm1023_vm7, %v994_v26, %v1002_v13 }
 0x13a   :  { %v1032_v25 = vsel %vm1023_vm7, %v992_v29, %v1000_v31  ;;  %v1067_v36 = vmul.f32 %v1046_v21, %v1033_v34 }
 0x13b   :  { %v1063_v38 = vmul.f32 %v1046_v21, %v1032_v25 }
 0x13c   :  { %v1010_v14 = vpop.permute.xlu1 %1009 }
 0x13d   :  { %v1029_v39 = vsel %vm1023_vm7, %v1002_v13, %v1010_v14  ;;  %v1008_v37 = vpop.permute.xlu0 %1007  ;;  %v1079_v1 = vpack.c.bf16 %v1067_v36, %v1063_v38 }
 0x13e   :  { %v1068_v15 = vmul.f32 %v1050_v35, %v1029_v39  ;;  %v1028_v44 = vsel %vm1023_vm7, %v1000_v31, %v1008_v37  ;;  %v1729_v31 = vld [vmem:[%s2689_s7 + $0x20] ss:$8 sm:$0xf] }
 0x13f   :  { %v1064_v43 = vmul.f32 %v1050_v35, %v1028_v44  ;;  %v1150_v25 = vrot.slane %v1729_v31, %v2070_v32  ;;  %v1154_v38 = vrot.slane %v1729_v31, %v2049_v20 }
 0x140   :  { %v1018_v3 = vpop.permute.xlu1 %1017 }
 0x141   :  { %v1025_v47 = vsel %vm1023_vm7, %v1010_v14, %v1018_v3  ;;  %v1037_v48 = vsel %vm1023_vm7, %v1018_v3, %v994_v26  ;;  %v1016_v2 = vpop.permute.xlu0 %1015  ;;  %v1080_v0 = vpack.c.bf16 %v1068_v15, %v1064_v43  ;;  %v1158_v43 = vrot.slane %v1729_v31, %v2062_v28 }
 0x142   :  { %v1069_v42 = vmul.f32 %v1054_v45, %v1025_v47  ;;  %v1070_v49 = vmul.f32 %v1058_v46, %v1037_v48  ;;  %v1024_v51 = vsel %vm1023_vm7, %v1008_v37, %v1016_v2  ;;  %v1036_v4 = vsel %vm1023_vm7, %v1016_v2, %v992_v29 }
 0x143   :  { %v1065_v52 = vmul.f32 %v1054_v45, %v1024_v51  ;;  %v1066_v53 = vmul.f32 %v1058_v46, %v1036_v4  ;;  %1248 = vmatprep.subr.bf16.mxu0 %v1080_v0  ;;  %v1162_v3 = vrot.slane %v1729_v31, %v2072_v33 }
 0x144   :  { %1249 = vmatpush1.bf16.msra.mxu0 %v1079_v1  ;;  %v998_v5 = vpop.permute.xlu1 %997 }
 0x145   :  { %v1081_v54 = vpack.c.bf16 %v1069_v42, %v1065_v52  ;;  %v996_v40 = vpop.permute.xlu0 %995  ;;  %v1082_v41 = vpack.c.bf16 %v1070_v49, %v1066_v53 }
 0x147   :  { %1301 = vmatprep.subr.bf16.mxu1 %v1082_v41 }
 0x148   :  { %1302 = vmatpush1.bf16.msra.mxu1 %v1081_v54  ;;  %v1006_v6 = vpop.permute.xlu1 %1005 }
 0x149   :  { %v1004_v55 = vpop.permute.xlu0 %1003  ;;  %v1035_v56 = vsel %vm1023_vm7, %v998_v5, %v1006_v6 }
 0x14a   :  { %v1034_v58 = vsel %vm1023_vm7, %v996_v40, %v1004_v55  ;;  %v1075_v59 = vmul.f32 %v1046_v21, %v1035_v56 }
 0x14b   :  { %v1071_v60 = vmul.f32 %v1046_v21, %v1034_v58 }
 0x14c   :  { %v1014_v7 = vpop.permute.xlu1 %1013 }
 0x14d   :  { %v1031_v50 = vsel %vm1023_vm7, %v1006_v6, %v1014_v7  ;;  %v1012_v61 = vpop.permute.xlu0 %1011  ;;  %v1083_v57 = vpack.c.bf16 %v1075_v59, %v1071_v60 }
 0x14e   :  { %v1076_v62 = vmul.f32 %v1050_v35, %v1031_v50  ;;  %v1030_v63 = vsel %vm1023_vm7, %v1004_v55, %v1012_v61 }
 0x14f   :  { %v1072_v8 = vmul.f32 %v1050_v35, %v1030_v63 }
 0x150   :  { %v1022_v9 = vpop.permute.xlu1 %1021 }
 0x151   :  { %v1027_v17 = vsel %vm1023_vm7, %v1014_v7, %v1022_v9  ;;  %v1039_v18 = vsel %vm1023_vm7, %v1022_v9, %v998_v5  ;;  %v1020_v22 = vpop.permute.xlu0 %1019  ;;  %v1084_v10 = vpack.c.bf16 %v1076_v62, %v1072_v8 }
 0x152   :  { %v1077_v11 = vmul.f32 %v1054_v45, %v1027_v17  ;;  %v1078_v23 = vmul.f32 %v1058_v46, %v1039_v18  ;;  %v1026_v24 = vsel %vm1023_vm7, %v1012_v61, %v1020_v22  ;;  %v1038_v26 = vsel %vm1023_vm7, %v1020_v22, %v996_v40 }
 0x153   :  { %v1073_v27 = vmul.f32 %v1054_v45, %v1026_v24  ;;  %v1074_v29 = vmul.f32 %v1058_v46, %v1038_v26  ;;  %1250 = vmatprep.subr.bf16.mxu0 %v1084_v10 }
 0x154   :  { %1251 = vmatpush1.bf16.msra.mxu0 %v1083_v57  ;;  %v1098_v12 = vpop.permute.xlu1 %1097 }
 0x155   :  { %v1085_v30 = vpack.c.bf16 %v1077_v11, %v1073_v27  ;;  %v1096_v13 = vpop.permute.xlu0 %1095  ;;  %v1086_v21 = vpack.c.bf16 %v1078_v23, %v1074_v29  ;;  %v1814_v29 = vld [vmem:[%s2688_s1 + $0x20] sm:$0xff]  }
 0x157   :  { %1303 = vmatprep.subr.bf16.mxu1 %v1086_v21 }
 0x158   :  { %1304 = vmatpush1.bf16.msra.mxu1 %v1085_v30  ;;  %v1106_v34 = vpop.permute.xlu1 %1105 }
 0x159   :  { %v1104_v35 = vpop.permute.xlu0 %1103  ;;  %v1137_v14 = vsel %vm1127_vm8, %v1098_v12, %v1106_v34 }
 0x15a   :  { %v1136_v36 = vsel %vm1127_vm8, %v1096_v13, %v1104_v35  ;;  %v1171_v37 = vmul.f32 %v1150_v25, %v1137_v14 }
 0x15b   :  { %v1167_v15 = vmul.f32 %v1150_v25, %v1136_v36 }
 0x15c   :  { %v1114_v39 = vpop.permute.xlu1 %1113 }
 0x15d   :  { %v1133_v44 = vsel %vm1127_vm8, %v1106_v34, %v1114_v39  ;;  %v1112_v45 = vpop.permute.xlu0 %1111  ;;  %v1183_v48 = vpack.c.bf16 %v1171_v37, %v1167_v15 }
 0x15e   :  { %v1172_v46 = vmul.f32 %v1154_v38, %v1133_v44  ;;  %v1132_v32 = vsel %vm1127_vm8, %v1104_v35, %v1112_v45 }
 0x15f   :  { %v1168_v1 = vmul.f32 %v1154_v38, %v1132_v32 }
 0x160   :  { %v1122_v47 = vpop.permute.xlu1 %1121 }
 0x161   :  { %v1129_v20 = vsel %vm1127_vm8, %v1114_v39, %v1122_v47  ;;  %v1141_v2 = vsel %vm1127_vm8, %v1122_v47, %v1098_v12  ;;  %v1120_v0 = vpop.permute.xlu0 %1119  ;;  %v1184_v42 = vpack.c.bf16 %v1172_v46, %v1168_v1 }
 0x162   :  { %v1173_v49 = vmul.f32 %v1158_v43, %v1129_v20  ;;  %v1174_v51 = vmul.f32 %v1162_v3, %v1141_v2  ;;  %v1128_v4 = vsel %vm1127_vm8, %v1112_v45, %v1120_v0  ;;  %v1140_v28 = vsel %vm1127_vm8, %v1120_v0, %v1096_v13 }
 0x163   :  { %v1169_v33 = vmul.f32 %v1158_v43, %v1128_v4  ;;  %v1170_v52 = vmul.f32 %v1162_v3, %v1140_v28  ;;  %1252 = vmatprep.subr.bf16.mxu0 %v1184_v42  ;;  %v1849_v13 = vmov 0.0  }
 0x164   :  { %1253 = vmatpush1.bf16.msra.mxu0 %v1183_v48  ;;  %v1102_v53 = vpop.permute.xlu1 %1101 }
 0x165   :  { %v1185_v5 = vpack.c.bf16 %v1173_v49, %v1169_v33  ;;  %v1100_v54 = vpop.permute.xlu0 %1099  ;;  %v1186_v40 = vpack.c.bf16 %v1174_v51, %v1170_v52 }
 0x167   :  { %1305 = vmatprep.subr.bf16.mxu1 %v1186_v40 }
 0x168   :  { %1306 = vmatpush1.bf16.msra.mxu1 %v1185_v5  ;;  %v1110_v41 = vpop.permute.xlu1 %1109 }
 0x169   :  { %v1108_v6 = vpop.permute.xlu0 %1107  ;;  %v1139_v55 = vsel %vm1127_vm8, %v1102_v53, %v1110_v41 }
 0x16a   :  { %v1138_v56 = vsel %vm1127_vm8, %v1100_v54, %v1108_v6  ;;  %v1179_v7 = vmul.f32 %v1150_v25, %v1139_v55 }
 0x16b   :  { %v1175_v59 = vmul.f32 %v1150_v25, %v1138_v56 }
 0x16c   :  { %v1118_v58 = vpop.permute.xlu1 %1117 }
 0x16d   :  { %v1135_v60 = vsel %vm1127_vm8, %v1110_v41, %v1118_v58  ;;  %v1116_v50 = vpop.permute.xlu0 %1115  ;;  %v1187_v9 = vpack.c.bf16 %v1179_v7, %v1175_v59 }
 0x16e   :  { %v1180_v61 = vmul.f32 %v1154_v38, %v1135_v60  ;;  %v1134_v62 = vsel %vm1127_vm8, %v1108_v6, %v1116_v50 }
 0x16f   :  { %v1176_v63 = vmul.f32 %v1154_v38, %v1134_v62 }
 0x170   :  { %v1126_v8 = vpop.permute.xlu1 %1125 }
 0x171   :  { %v1131_v57 = vsel %vm1127_vm8, %v1118_v58, %v1126_v8  ;;  %v1143_v17 = vsel %vm1127_vm8, %v1126_v8, %v1102_v53  ;;  %v1124_v18 = vpop.permute.xlu0 %1123  ;;  %v1188_v22 = vpack.c.bf16 %v1180_v61, %v1176_v63 }
 0x172   :  { %v1181_v10 = vmul.f32 %v1158_v43, %v1131_v57  ;;  %v1182_v11 = vmul.f32 %v1162_v3, %v1143_v17  ;;  %v1130_v23 = vsel %vm1127_vm8, %v1116_v50, %v1124_v18  ;;  %v1142_v24 = vsel %vm1127_vm8, %v1124_v18, %v1100_v54 }
 0x173   :  { %v1177_v26 = vmul.f32 %v1158_v43, %v1130_v23  ;;  %v1178_v27 = vmul.f32 %v1162_v3, %v1142_v24  ;;  %1254 = vmatprep.subr.bf16.mxu0 %v1188_v22 }
 0x174   :  { %1255 = vmatpush1.bf16.msra.mxu0 %v1187_v9 }
 0x175   :  { %v1189_v12 = vpack.c.bf16 %v1181_v10, %v1177_v26  ;;  %v1190_v30 = vpack.c.bf16 %v1182_v11, %v1178_v27 }
 0x177   :  { %1736 = vmatmul.mubr.msk.bf16.vlgmr.msra.gmra.mrb[0].mxu0 %vm651_vm2, %v1814_v29  ;;  %1307 = vmatprep.subr.bf16.mxu1 %v1190_v30 }
 0x178   :  { %1308 = vmatpush1.bf16.msra.mxu1 %v1189_v12  ;;  %1286 = vmatprep.mubr.bf16.mxu0 %v1843_v16 }
 0x17b   :  { %1738 = vmatmul.mubr.msk.bf16.vlgmr.msra.gmra.mrb[0].mxu1 %vm651_vm2, %v1814_v29 }
 0x17c   :  { %1339 = vmatprep.mubr.bf16.mxu1 %v1843_v16 }
 0x17f   :  { %1737 = vmatmul.mubr.msk.bf16.gmra.mrb[4].mxu0 %vm651_vm2, %v1815_v19 }
 0x180   :  { %1533 = vmatprep.mubr.f32.mxu0 %v1849_v13 }
 0x181   :  { %v1378_v35 = vpop.permute.xlu1 %1377 }
 0x182   :  { %v1373_v21 = vpop.permute.xlu0 %1372 }
 0x183   :  { %1739 = vmatmul.mubr.msk.bf16.gmra.mrb[4].mxu1 %vm651_vm2, %v1815_v19 }
 0x184   :  { %1616 = vmatprep.mubr.f32.mxu1 %v1849_v13 }
 0x186   :  { %v1383_v42 = vpop.permute.xlu1 %1382 }
 0x187   :  { %v1388_v40 = vpop.permute.xlu0 %1387 }
 0x24a   :  { %v1278_v31 = vpop.f32.mrb[0].mxu0 }
 0x24b   :  { %v1390_v34 = vadd.f32 %v1373_v21, %v1278_v31  ;;  %v1280_v25 = vpop.f32.mrb[1].mxu0 }
 0x24c   :  { %v1391_v14 = vadd.f32 %v1373_v21, %v1280_v25  ;;  %v1282_v36 = vpop.f32.mrb[2].mxu0 }
 0x24d   :  { %v1406_v38 = vmul.f32 0.1, %v1390_v34  ;;  %v1394_v39 = vadd.f32 %v1378_v35, %v1282_v36  ;;  %v1284_v37 = vpop.f32.mrb[3].mxu0 }
 0x24e   :  { %v1407_v16 = vmul.f32 0.1, %v1391_v14  ;;  %v1395_v15 = vadd.f32 %v1378_v35, %v1284_v37  ;;  %v1331_v44 = vpop.f32.mrb[0].mxu1 }
 0x24f   :  { %v1410_v45 = vmul.f32 0.1, %v1394_v39  ;;  %v1392_v46 = vadd.f32 %v1373_v21, %v1331_v44  ;;  %v1333_v32 = vpop.f32.mrb[1].mxu1  ;;  %v1422_v47 = vmax.f32 %v1390_v34, %v1406_v38  ;;  %v1438_v44 = vld [vmem:[%s2692_s3] sm:$0xff] }
 0x250   :  { %v1411_v43 = vmul.f32 0.1, %v1395_v15  ;;  %v1393_v3 = vadd.f32 %v1373_v21, %v1333_v32  ;;  %v1335_v1 = vpop.f32.mrb[2].mxu1  ;;  %v1423_v49 = vmax.f32 %v1391_v14, %v1407_v16  ;;  %v1440_v32 = vld [vmem:[%s2692_s3 + $0x10] sm:$0xff] }
 0x251   :  { %v1426_v48 = vmax.f32 %v1394_v39, %v1410_v45  ;;  %v1408_v20 = vmul.f32 0.1, %v1392_v46  ;;  %v1396_v2 = vadd.f32 %v1378_v35, %v1335_v1  ;;  %v1337_v0 = vpop.f32.mrb[3].mxu1 }
 0x252   :  { %v1427_v51 = vmax.f32 %v1395_v15, %v1411_v43  ;;  %v1409_v4 = vmul.f32 0.1, %v1393_v3  ;;  %v1397_v28 = vadd.f32 %v1378_v35, %v1337_v0  ;;  %v1288_v33 = vpop.f32.mrb[4].mxu0  ;;  %v1457_v43 = vpop.permute.xlu1 %1456  ;;  %v1643_v0 = vld [vmem:[%s2694_s6] sm:$0xff] }
 0x253   :  { %v1752_v52 = vpack.c.bf16 %v1426_v48, %v1422_v47  ;;  %v1412_v53 = vmul.f32 0.1, %v1396_v2  ;;  %v1398_v5 = vadd.f32 %v1383_v42, %v1288_v33  ;;  %v1290_v54 = vpop.f32.mrb[5].mxu0  ;;  %v1424_v58 = vmax.f32 %v1392_v46, %v1408_v20  ;;  %v1439_v46 = vld [vmem:[%s2692_s3 + $0x8] sm:$0xff]  ;;  %v1635_v47 = vld [vmem:[%s2693_s5] sm:$0xff] }
 0x254   :  { %v1413_v41 = vmul.f32 0.1, %v1397_v28  ;;  %v1399_v6 = vadd.f32 %v1383_v42, %v1290_v54  ;;  %v1292_v55 = vpop.f32.mrb[6].mxu0  ;;  %v1750_v56 = vpack.c.bf16 %v1427_v51, %v1423_v49  ;;  %v1425_v61 = vmax.f32 %v1393_v3, %v1409_v4  ;;  %v1644_v51 = vld [vmem:[%s2694_s6 + $0x8] sm:$0xff] }
 0x255   :  { %v1428_v7 = vmax.f32 %v1396_v2, %v1412_v53  ;;  %v1414_v59 = vmul.f32 0.1, %v1398_v5  ;;  %v1402_v60 = vadd.f32 %v1388_v40, %v1292_v55  ;;  %v1294_v50 = vpop.f32.mrb[7].mxu0  ;;  %v1636_v2 = vld [vmem:[%s2693_s5 + $0x8] sm:$0xff] }
 0x256   :  { %v1429_v62 = vmax.f32 %v1397_v28, %v1413_v41  ;;  %v1415_v63 = vmul.f32 0.1, %v1399_v6  ;;  %v1403_v8 = vadd.f32 %v1388_v40, %v1294_v50  ;;  %v1341_v9 = vpop.f32.mrb[4].mxu1  ;;  %1751 = vmatprep.subr.bf16.mxu0 %v1750_v56  ;;  %v1447_v3 = vpop.permute.xlu1 %1446  ;;  %v1645_v56 = vld [vmem:[%s2694_s6 + $0x10] sm:$0xff]  ;;  %v1646_v50 = vld [vmem:[%s2694_s6 + $0x18] sm:$0xff] }
 0x257   :  { %v1760_v57 = vpack.c.bf16 %v1428_v7, %v1424_v58  ;;  %v1418_v17 = vmul.f32 0.1, %v1402_v60  ;;  %v1400_v18 = vadd.f32 %v1383_v42, %v1341_v9  ;;  %v1343_v22 = vpop.f32.mrb[5].mxu1  ;;  %1753 = vmatpush1.bf16.msra.mxu0 %v1752_v52  ;;  %v1430_v26 = vmax.f32 %v1398_v5, %v1414_v59  ;;  %v1637_v52 = vld [vmem:[%s2693_s5 + $0x10] sm:$0xff] }
 0x258   :  { %v1419_v10 = vmul.f32 0.1, %v1403_v8  ;;  %v1401_v11 = vadd.f32 %v1383_v42, %v1343_v22  ;;  %v1345_v23 = vpop.f32.mrb[6].mxu1  ;;  %v1758_v24 = vpack.c.bf16 %v1429_v62, %v1425_v61  ;;  %v1431_v19 = vmax.f32 %v1399_v6, %v1415_v63  ;;  %v1638_v6 = vld [vmem:[%s2693_s5 + $0x18] sm:$0xff] }
 0x259   :  { %v1434_v27 = vmax.f32 %v1402_v60, %v1418_v17  ;;  %v1416_v29 = vmul.f32 0.1, %v1400_v18  ;;  %v1404_v12 = vadd.f32 %v1388_v40, %v1345_v23  ;;  %v1347_v30 = vpop.f32.mrb[7].mxu1 }
 0x25a   :  { %v1435_v21 = vmax.f32 %v1403_v8, %v1419_v10  ;;  %v1417_v31 = vmul.f32 0.1, %v1401_v11  ;;  %v1405_v34 = vadd.f32 %v1388_v40, %v1347_v30  ;;  %1759 = vmatprep.subr.bf16.mxu1 %v1758_v24 }
 0x25b   :  { %v1756_v25 = vpack.c.bf16 %v1434_v27, %v1430_v26  ;;  %v1420_v35 = vmul.f32 0.1, %v1404_v12  ;;  %1761 = vmatpush1.bf16.msra.mxu1 %v1760_v57  ;;  %v1432_v38 = vmax.f32 %v1400_v18, %v1416_v29 }
 0x25c   :  { %v1421_v14 = vmul.f32 0.1, %v1405_v34  ;;  %v1754_v36 = vpack.c.bf16 %v1435_v21, %v1431_v19  ;;  %v1433_v37 = vmax.f32 %v1401_v11, %v1417_v31 }
 0x25d   :  { %v1436_v39 = vmax.f32 %v1404_v12, %v1420_v35  ;;  %v1664_v35 = vld [vmem:[%s2693_s5 + $0x28] sm:$0xff] }
 0x25e   :  { %v1437_v16 = vmax.f32 %v1405_v34, %v1421_v14  ;;  %1755 = vmatprep.subr.bf16.mxu0 %v1754_v36 }
 0x25f   :  { %v1764_v15 = vpack.c.bf16 %v1436_v39, %v1432_v38  ;;  %1757 = vmatpush1.bf16.msra.mxu0 %v1756_v25  ;;  %v1663_v25 = vld [vmem:[%s2693_s5 + $0x20] sm:$0xff] }
 0x260   :  { %v1762_v45 = vpack.c.bf16 %v1437_v16, %v1433_v37  ;;  %v1665_v37 = vld [vmem:[%s2693_s5 + $0x30] sm:$0xff] }
 0x262   :  { %1740 = vmatmul.mubr.msk.f32.vlgmr.msra.gmra.mrb[8].mxu0 %vm1459_vm9, %v1438_v44  ;;  %1763 = vmatprep.subr.bf16.mxu1 %v1762_v45  ;;  %v1666_v45 = vld [vmem:[%s2693_s5 + $0x38] sm:$0xff] }
 0x263   :  { %1765 = vmatpush1.bf16.msra.mxu1 %v1764_v15  ;;  %1539 = vmatprep.mubr.f32.mxu0 %v1849_v13 }
 0x266   :  { %1741 = vmatmul.mubr.msk.f32.gmra.mrb[10].mxu0 %vm1459_vm9, %v1439_v46  ;;  %1743 = vmatmul.mubr.msk.f32.vlgmr.msra.gmra.mrb[8].mxu1 %vm1459_vm9, %v1438_v44 }
 0x267   :  { %1545 = vmatprep.mubr.f32.mxu0 %v1849_v13  ;;  %1622 = vmatprep.mubr.f32.mxu1 %v1849_v13 }
 0x26a   :  { %1742 = vmatmul.mubr.msk.f32.gmra.mrb[12].mxu0 %vm1459_vm9, %v1440_v32  ;;  %1744 = vmatmul.mubr.msk.f32.gmra.mrb[10].mxu1 %vm1459_vm9, %v1439_v46 }
 0x26b   :  { %1628 = vmatprep.mubr.f32.mxu1 %v1849_v13  ;;  %v1452_v13 = vpop.permute.xlu0 %1451 }
 0x26e   :  { %1745 = vmatmul.mubr.msk.f32.gmra.mrb[12].mxu1 %vm1459_vm9, %v1440_v32 }
 0x335   :  { %v1535_v1 = vpop.f32.mrb[8].mxu0 }
 0x336   :  { %v1536_v48 = vadd.f32 %v1535_v1, %v1447_v3  ;;  %v1537_v20 = vpop.f32.mrb[9].mxu0 }
 0x337   :  { %v1538_v42 = vadd.f32 %v1537_v20, %v1447_v3 }
 0x338   :  { %v1639_v49 = vmul.f32 %v1635_v47, %v1536_v48 }
 0x339   :  { %v1640_v4 = vmul.f32 %v1636_v2, %v1538_v42  ;;  %v1541_v28 = vpop.f32.mrb[10].mxu0  ;;  %v1618_v33 = vpop.f32.mrb[8].mxu1 }
 0x33a   :  { %v1647_v53 = vadd.f32 %v1643_v0, %v1639_v49  ;;  %v1542_v5 = vadd.f32 %v1541_v28, %v1452_v13  ;;  %v1619_v54 = vadd.f32 %v1618_v33, %v1447_v3  ;;  %v1543_v40 = vpop.f32.mrb[11].mxu0  ;;  %v1620_v41 = vpop.f32.mrb[9].mxu1 }
 0x33b   :  { %v1648_v55 = vadd.f32 %v1644_v51, %v1640_v4  ;;  %v1544_v58 = vadd.f32 %v1543_v40, %v1452_v13  ;;  %v1621_v7 = vadd.f32 %v1620_v41, %v1447_v3 }
 0x33c   :  { %1651 = vst [vmem:[%s2695_s8] sm:$0xff] %v1647_v53  ;;  %v1655_v59 = vmul.f32 1.442695, %v1542_v5  ;;  %v1641_v60 = vmul.f32 %v1637_v52, %v1619_v54 }
 0x33d   :  { %1652 = vst [vmem:[%s2695_s8 + $0x8] sm:$0xff] %v1648_v55  ;;  %v1657_v61 = vmul.f32 1.442695, %v1544_v58  ;;  %v1642_v62 = vmul.f32 %v1638_v6, %v1621_v7  ;;  %v1547_v63 = vpop.f32.mrb[12].mxu0  ;;  %v1624_v8 = vpop.f32.mrb[10].mxu1 }
 0x33e   :  { %1816 = vpow2.f32 %v1655_v59  ;;  %v1649_v9 = vadd.f32 %v1645_v56, %v1641_v60  ;;  %v1548_v57 = vadd.f32 %v1547_v63, %v1457_v43  ;;  %v1625_v17 = vadd.f32 %v1624_v8, %v1452_v13  ;;  %v1549_v18 = vpop.f32.mrb[13].mxu0  ;;  %v1626_v22 = vpop.f32.mrb[11].mxu1 }
 0x33f   :  { %1818 = vpow2.f32 %v1657_v61  ;;  %v1650_v10 = vadd.f32 %v1646_v50, %v1642_v62  ;;  %v1550_v11 = vadd.f32 %v1549_v18, %v1457_v43  ;;  %v1627_v23 = vadd.f32 %v1626_v22, %v1452_v13 }
 0x340   :  { %1653 = vst [vmem:[%s2695_s8 + $0x10] sm:$0xff] %v1649_v9  ;;  %v1746_v24 = vmul.f32 -1.442695, %v1548_v57  ;;  %v1659_v26 = vmul.f32 1.442695, %v1625_v17 }
 0x341   :  { %1654 = vst [vmem:[%s2695_s8 + $0x18] sm:$0xff] %v1650_v10  ;;  %v1747_v27 = vmul.f32 -1.442695, %v1550_v11  ;;  %v1661_v29 = vmul.f32 1.442695, %v1627_v23  ;;  %v1630_v12 = vpop.f32.mrb[12].mxu1 }
 0x342   :  { %1820 = vpow2.f32 %v1746_v24  ;;  %v1631_v30 = vadd.f32 %v1630_v12, %v1457_v43  ;;  %v1632_v19 = vpop.f32.mrb[13].mxu1 }
 0x343   :  { %1822 = vpow2.f32 %v1659_v26  ;;  %v1633_v21 = vadd.f32 %v1632_v19, %v1457_v43 }
 0x344   :  { %1824 = vpow2.f32 %v1747_v27  ;;  %v1748_v31 = vmul.f32 -1.442695, %v1631_v30 }
 0x345   :  { %1826 = vpow2.f32 %v1661_v29  ;;  %v1749_v34 = vmul.f32 -1.442695, %v1633_v21 }
 0x346   :  { %1828 = vpow2.f32 %v1748_v31 }
 0x347   :  { %1830 = vpow2.f32 %v1749_v34 }
 0x348   :  { %v1817_v14 = vpop.eup %1816 }
 0x349   :  { %v1819_v36 = vpop.eup %1818  ;;  %v1667_v38 = vmul.f32 %v1817_v14, %v1663_v25 }
 0x34a   :  { %v1668_v39 = vmul.f32 %v1819_v36, %v1664_v35 }
 0x34b   :  { %1671 = vst [vmem:[%s2695_s8 + $0x20] sm:$0xff] %v1667_v38 }
 0x34c   :  { %v1821_v16 = vpop.eup %1820  ;;  %1672 = vst [vmem:[%s2695_s8 + $0x28] sm:$0xff] %v1668_v39 }
 0x34d   :  { %v1823_v15 = vpop.eup %1822  ;;  %v1687_v44 = vadd.f32 1.0, %v1821_v16 }
 0x34e   :  { %v1825_v46 = vpop.eup %1824  ;;  %v1669_v32 = vmul.f32 %v1823_v15, %v1665_v37 }
 0x34f   :  { %v1827_v43 = vpop.eup %1826  ;;  %1832 = vrcp.f32 %v1687_v44  ;;  %v1688_v3 = vadd.f32 1.0, %v1825_v46 }
 0x350   :  { %v1829_v1 = vpop.eup %1828  ;;  %1673 = vst [vmem:[%s2695_s8 + $0x30] sm:$0xff] %v1669_v32  ;;  %v1670_v47 = vmul.f32 %v1827_v43, %v1666_v45 }
 0x351   :  { %v1831_v48 = vpop.eup %1830  ;;  %1834 = vrcp.f32 %v1688_v3  ;;  %v1689_v20 = vadd.f32 1.0, %v1829_v1 }
 0x352   :  { %1674 = vst [vmem:[%s2695_s8 + $0x38] sm:$0xff] %v1670_v47  ;;  %v1690_v2 = vadd.f32 1.0, %v1831_v48 }
 0x353   :  { %1836 = vrcp.f32 %v1689_v20 }
 0x354   :  { %1838 = vrcp.f32 %v1690_v2 }
 0x359   :  { %v1833_v0 = vpop.eup %1832 }
 0x35a   :  { %1699 = vst [vmem:[%s2695_s8 + $0x40] sm:$0xff] %v1833_v0 }
 0x35b   :  { %v1835_v42 = vpop.eup %1834 }
 0x35c   :  { %1700 = vst [vmem:[%s2695_s8 + $0x48] sm:$0xff] %v1835_v42 }
 0x35d   :  { %v1837_v13 = vpop.eup %1836 }
 0x35e   :  { %v1839_v49 = vpop.eup %1838  ;;  %1701 = vst [vmem:[%s2695_s8 + $0x50] sm:$0xff] %v1837_v13 }
 0x35f   :  { %1702 = vst [vmem:[%s2695_s8 + $0x58] sm:$0xff] %v1839_v49 }

</bundles_post_ra>
